<compile_context>
chip_gen: v6e
topology: v6e:2x2x1
jax: 0.10.0
libtpu: 0.0.40
codegen_flags: <defaults>
</compile_context>

<pallas_src>
import math

import jax
import jax.numpy as jnp
from jax.experimental import pallas as pl
from jax.experimental.pallas import tpu as pltpu

TAU = 2.0        # LIFNode tau
V_TH = 1.0       # LIFNode v_threshold
BN_EPS = 1e-5
K = 5            # conv kernel size
PAD = 2          # "same" padding for 5x5


# --------------------------------------------------------------------------
# Generation-aware grid sizing: one big step on single-TC chips (v5e/v6e) to
# minimise the ~0.35us/step overhead; two steps on v7x (2 TensorCores).
# --------------------------------------------------------------------------
def _detect_multi_tc():
    try:
        kind = jax.devices()[0].device_kind.lower()
        return ("v7" in kind) or ("7x" in kind)
    except Exception:
        return False


_IS_MULTI_TC = _detect_multi_tc()


def _grid_steps(n):
    if n <= 1:
        return 1
    steps = 2 if _IS_MULTI_TC else 1
    while n % steps:
        steps -= 1
    return steps


# --------------------------------------------------------------------------
# Weight pre-transform: fold dx shifts + width padding into a block-Toeplitz
# matrix.  wt[dy][xin*Cin + ci, xout*Cout + co] = w[dy, xin-xout+PAD, ci, co]
# (zero where the tap falls outside the kernel / into the width padding).
# --------------------------------------------------------------------------
def toeplitz_weights(w, W):
    # w: (K, K, Cin, Cout) -> (K, W*Cin, W*Cout)
    Kk, _, Cin, Cout = w.shape
    xin = jnp.arange(W)[:, None]                  # (W, 1) input column
    xout = jnp.arange(W)[None, :]                 # (1, W) output column
    dx = xin - xout + PAD                         # (W, W)
    valid = (dx >= 0) & (dx < Kk)
    dx_c = jnp.clip(dx, 0, Kk - 1)
    wt5 = w[:, dx_c, :, :] * valid[None, :, :, None, None]   # (K, W, W, Cin, Cout)
    return wt5.transpose(0, 1, 3, 2, 4).reshape(Kk, W * Cin, W * Cout)
    # TODO(synk): for W*Cin, W*Cout large enough that K*(W*Cin)*(W*Cout)*4 B
    # approaches v7x's 64 MiB VMEM, tile the output-lane axis of wt instead
    # of keeping it fully resident.


# --------------------------------------------------------------------------
# conv1: 5x5 "same" conv (no bias) + per-lane BN1 partial statistics.
#   x_ref : (BI, H+4, W*Cin)   row-halo pre-padded, lane-dense channels-last
#   wt_ref: (K, W*Cin, W*Cout) Toeplitz weights
#   y_ref : (BI, H, W*Cout)    lane-dense conv output
#   st_ref: (1, 2, W*Cout)     per-grid-step [sum; sum^2] over rows
# --------------------------------------------------------------------------
def _conv_stats_kernel(x_ref, wt_ref, y_ref, st_ref):
    BI, _, WCin = x_ref.shape
    H = y_ref.shape[1]
    WCout = y_ref.shape[-1]
    Kk = wt_ref.shape[0]

    # 5 matmuls (one per dy), each (BI*H, W*Cin) x (W*Cin, W*Cout).
    acc = jnp.zeros((BI * H, WCout), jnp.float32)
    for dy in range(Kk):                                    # static unroll: 5
        lhs = x_ref[:, dy:dy + H, :].reshape(BI * H, WCin)
        acc = acc + jnp.dot(lhs, wt_ref[dy],
                            preferred_element_type=jnp.float32)

    y_ref[...] = acc.reshape(BI, H, WCout)                  # lane-dense store

    # BN partial stats fused into the conv epilogue (per-lane, reduced on host).
    st_ref[0, 0:1, :] = jnp.sum(acc, axis=0, keepdims=True)
    st_ref[0, 1:2, :] = jnp.sum(acc * acc, axis=0, keepdims=True)


def conv5x5_stats(x_pad, wt):
    # x_pad: [B, H+2*PAD, W*Cin]   wt: [K, W*Cin, W*Cout]
    B, Hp, WCin = x_pad.shape
    H = Hp - 2 * PAD
    WCout = wt.shape[-1]
    n_steps = _grid_steps(B)
    BI = B // n_steps

    y, st = pl.pallas_call(
        _conv_stats_kernel,
        out_shape=(jax.ShapeDtypeStruct((B, H, WCout), jnp.float32),
                   jax.ShapeDtypeStruct((n_steps, 2, WCout), jnp.float32)),
        grid=(n_steps,),
        in_specs=[
            pl.BlockSpec((BI, Hp, WCin), lambda b: (b, 0, 0)),
            pl.BlockSpec(wt.shape, lambda b: (0, 0, 0)),
        ],
        out_specs=(
            pl.BlockSpec((BI, H, WCout), lambda b: (b, 0, 0)),
            pl.BlockSpec((1, 2, WCout), lambda b: (b, 0, 0)),
        ),
        compiler_params=pltpu.CompilerParams(
            dimension_semantics=("parallel",)),
    )(x_pad, wt)
    return y, st


def finalize_stats(st, W, C, m):
    # st: [n_steps, 2, W*C] partial per-lane sums -> per-channel mean / var.
    s = jnp.sum(st, axis=0).reshape(2, W, C).sum(axis=1)    # (2, C)
    mean = s[0] / m
    var = s[1] / m - mean * mean
    # NOTE: single-pass E[x^2]-E[x]^2 in f32; adequate here since the conv
    # outputs are zero-mean-ish.  Switch to a shifted two-pass variance if
    # bit-fidelity vs torch.batch_norm at large means is required.
    return mean, var


# --------------------------------------------------------------------------
# Fused: TEBN1 affine (folded per-timestep) + LIF recurrence + L1 +
#        conv2 (Toeplitz, 5 matmuls) + BN2 partial statistics.
# Spikes live only in the VMEM scratch (row-halo pre-zeroed), never in HBM.
#   y1_ref: (T, BN, H, WC1)   a_ref/b_ref: (T, WC1)   wt_ref: (K, WC1, WC2)
#   y2_ref: (T, BN, H, WC2)   st_ref: (1, 2, WC2)     l1_ref: (1, 1, WC1)
#   spad_ref: VMEM (T*BN, H+4, WC1)
# --------------------------------------------------------------------------
def _bn_lif_conv2_kernel(y1_ref, a_ref, b_ref, wt_ref,
                         y2_ref, st_ref, l1_ref, spad_ref):
    T, BN, H, WC1 = y1_ref.shape
    WC2 = y2_ref.shape[-1]
    Kk = wt_ref.shape[0]

    # Zero only the 2-row top/bottom halo of the spike scratch (width padding
    # is folded into the Toeplitz weights, so no column halo is needed).
    spad_ref[:, :PAD, :] = jnp.zeros((T * BN, PAD, WC1), jnp.float32)
    spad_ref[:, PAD + H:, :] = jnp.zeros((T * BN, PAD, WC1), jnp.float32)

    inv_tau = 1.0 / TAU
    v = jnp.zeros((BN, H, WC1), jnp.float32)     # membrane potential
    l1 = jnp.zeros((BN, H, WC1), jnp.float32)    # per-lane L1 accumulator
    for t in range(T):                           # static unroll over T
        a = a_ref[t:t + 1, :]                    # (1, WC1)
        b = b_ref[t:t + 1, :]
        bn = y1_ref[t] * a + b                   # folded TEBN1, (BN, H, WC1)
        v = v + (bn - v) * inv_tau               # charge (decay_input=True)
        spike = (v >= V_TH).astype(jnp.float32)
        v = v * (1.0 - spike)                    # hard reset to v_reset = 0
        spad_ref[t * BN:(t + 1) * BN, PAD:PAD + H, :] = spike
        l1 = l1 + spike                          # |spike| == spike
    l1_ref[0, 0:1, :] = jnp.sum(l1.reshape(BN * H, WC1), axis=0, keepdims=True)

    # conv2: 5 matmuls, LHS stacked over all (t, image, row) rows.
    acc = jnp.zeros((T * BN * H, WC2), jnp.float32)
    for dy in range(Kk):                         # static unroll: 5
        lhs = spad_ref[:, dy:dy + H, :].reshape(T * BN * H, WC1)
        acc = acc + jnp.dot(lhs, wt_ref[dy],
                            preferred_element_type=jnp.float32)

    y2_ref[...] = acc.reshape(T, BN, H, WC2)

    # BN2 partial stats fused into the conv2 epilogue.
    st_ref[0, 0:1, :] = jnp.sum(acc, axis=0, keepdims=True)
    st_ref[0, 1:2, :] = jnp.sum(acc * acc, axis=0, keepdims=True)


def bn_lif_conv2(y1, a_lane, b_lane, wt2):
    # y1: [T, N, H, WC1]   a_lane/b_lane: [T, WC1]   wt2: [K, WC1, WC2]
    T, N, H, WC1 = y1.shape
    WC2 = wt2.shape[-1]
    n_steps = _grid_steps(N)
    BN = N // n_steps

    y2, st, l1p = pl.pallas_call(
        _bn_lif_conv2_kernel,
        out_shape=(jax.ShapeDtypeStruct((T, N, H, WC2), jnp.float32),
                   jax.ShapeDtypeStruct((n_steps, 2, WC2), jnp.float32),
                   jax.ShapeDtypeStruct((n_steps, 1, WC1), jnp.float32)),
        grid=(n_steps,),
        in_specs=[
            pl.BlockSpec((T, BN, H, WC1), lambda n: (0, n, 0, 0)),
            pl.BlockSpec((T, WC1), lambda n: (0, 0)),
            pl.BlockSpec((T, WC1), lambda n: (0, 0)),
            pl.BlockSpec(wt2.shape, lambda n: (0, 0, 0)),
        ],
        out_specs=(
            pl.BlockSpec((T, BN, H, WC2), lambda n: (0, n, 0, 0)),
            pl.BlockSpec((1, 2, WC2), lambda n: (n, 0, 0)),
            pl.BlockSpec((1, 1, WC1), lambda n: (n, 0, 0)),
        ),
        scratch_shapes=[pltpu.VMEM((T * BN, H + 2 * PAD, WC1), jnp.float32)],
        compiler_params=pltpu.CompilerParams(
            dimension_semantics=("parallel",)),
    )(y1, a_lane, b_lane, wt2)
    return y2, st, l1p


# --------------------------------------------------------------------------
# Full forward pass (equivalent of SEW_RDB_con5_with_BNTT_and_mines.forward).
# --------------------------------------------------------------------------
def sew_rdb_forward(x, params):
    # x: [T, N, Cin, H, W]  (PyTorch multi-step NCHW)
    T, N, Cin, H, W = x.shape
    Cout = params["conv1_w"].shape[-1]
    B = T * N
    m = B * H * W

    # channels-last, lane-dense [B, H, W*Cin], with the 2-row conv halo
    # pre-padded once in HBM (XLA fuses the pad with the transpose).
    x_cl = jnp.transpose(x, (0, 1, 3, 4, 2)).reshape(B, H, W * Cin)
    x_pad = jnp.pad(x_cl, ((0, 0), (PAD, PAD), (0, 0)))

    # ---- conv1 (+ fused BN1 partial stats) ----
    wt1 = toeplitz_weights(params["conv1_w"], W)
    y1, st1 = conv5x5_stats(x_pad, wt1)                     # [B, H, W*Cout]
    mean1, var1 = finalize_stats(st1, W, Cout, m)

    # TEBN1 fold: out = scale[t] * (gamma * x_hat + beta)
    a1 = params["bn1_gamma"] / jnp.sqrt(var1 + BN_EPS)
    b1 = params["bn1_beta"] - mean1 * a1
    a1t = a1[None, :] * params["bn1_scale"][:, None]        # (T, Cout)
    b1t = b1[None, :] * params["bn1_scale"][:, None]
    a1_lane = jnp.tile(a1t, (1, W))                         # (T, W*Cout)
    b1_lane = jnp.tile(b1t, (1, W))

    # ---- TEBN1 + LIF + L1 + conv2 (+ fused BN2 stats), single kernel ----
    wt2 = toeplitz_weights(params["conv2_w"], W)
    y2, st2, l1p = bn_lif_conv2(y1.reshape(T, N, H, W * Cout),
                                a1_lane, b1_lane, wt2)
    mean2, var2 = finalize_stats(st2, W, Cout, m)
    l1 = jnp.sum(l1p)

    # ---- TEBN2 affine: plain jnp broadcast, fused by XLA with the final
    #      channels-last -> NCHW transpose (no extra kernel / HBM pass) ----
    a2 = params["bn2_gamma"] / jnp.sqrt(var2 + BN_EPS)
    b2 = params["bn2_beta"] - mean2 * a2
    a2t = a2[None, :] * params["bn2_scale"][:, None]        # (T, Cout)
    b2t = b2[None, :] * params["bn2_scale"][:, None]
    out = (y2.reshape(T, N, H, W, Cout) * a2t[:, None, None, None, :]
           + b2t[:, None, None, None, :])
    out_nchw = jnp.transpose(out, (0, 1, 4, 2, 3))
    return x, out_nchw, l1
    # TODO(synk): BN running-stat (momentum) updates are training-time state
    # mutation with no effect on this forward's outputs; not implemented.


if __name__ == "__main__":
    T, N, Cin, Cout, H, W = 4, 2, 4, 8, 16, 16
    key = jax.random.PRNGKey(0)
    ks = jax.random.split(key, 8)

    bound1 = 1.0 / math.sqrt(Cin * K * K)
    bound2 = 1.0 / math.sqrt(Cout * K * K)
    params = dict(
        conv1_w=jax.random.uniform(ks[0], (K, K, Cin, Cout), jnp.float32,
                                   -bound1, bound1),
        conv2_w=jax.random.uniform(ks[1], (K, K, Cout, Cout), jnp.float32,
                                   -bound2, bound2),
        # PyTorch defaults are gamma=1, beta=0, scale=1; perturb deterministically
        # so the affine/scale paths are exercised.
        bn1_gamma=1.0 + 0.1 * jax.random.normal(ks[2], (Cout,), jnp.float32),
        bn1_beta=0.1 * jax.random.normal(ks[3], (Cout,), jnp.float32),
        bn1_scale=1.0 + 0.1 * jax.random.normal(ks[4], (T,), jnp.float32),
        bn2_gamma=1.0 + 0.1 * jax.random.normal(ks[5], (Cout,), jnp.float32),
        bn2_beta=0.1 * jax.random.normal(ks[6], (Cout,), jnp.float32),
        bn2_scale=jnp.ones((T,), jnp.float32),
    )

    x = jax.random.normal(ks[7], (T, N, Cin, H, W), jnp.float32)

    fwd = jax.jit(sew_rdb_forward)
    x_identity, out, l1 = fwd(x, params)
    jax.block_until_ready((x_identity, out, l1))

    assert x_identity.shape == (T, N, Cin, H, W)
    assert out.shape == (T, N, Cout, H, W)
    assert l1.shape == ()
    assert bool(jnp.isfinite(out).all()) and bool(jnp.isfinite(l1))
    print("KERNEL_OK")
</pallas_src>

<mosaic_0001>
module attributes {stable_mosaic.version = 11 : i64} {
  func.func @_conv_stats_kernel(%arg0: i32, %arg1: memref<8x20x64xf32, #tpu.memory_space<vmem>>, %arg2: memref<5x64x128xf32, #tpu.memory_space<vmem>>, %arg3: memref<8x16x128xf32, #tpu.memory_space<vmem>>, %arg4: memref<1x2x128xf32, #tpu.memory_space<vmem>>) attributes {dimension_semantics = [#tpu.dimension_semantics<parallel>], iteration_bounds = array<i64: 1>, scalar_prefetch = 0 : i64, scratch_operands = 0 : i64, tpu.core_type = #tpu.core_type<tc>, window_params = [{transform_indices = @transform_0, window_bounds = array<i64: 8, 20, 64>}, {pipeline_mode = #tpu.pipeline_mode<synchronous>, transform_indices = @transform_1, window_bounds = array<i64: 5, 64, 128>}, {transform_indices = @transform_2, window_bounds = array<i64: 8, 16, 128>}, {transform_indices = @transform_3, window_bounds = array<i64: 1, 2, 128>}]} {
    %cst = arith.constant 0.000000e+00 : f32
    %0 = vector.broadcast %cst : f32 to vector<128x128xf32>
    %c0 = arith.constant 0 : index
    %c0_0 = arith.constant 0 : index
    %c0_1 = arith.constant 0 : index
    %1 = vector.load %arg1[%c0, %c0_0, %c0_1] : memref<8x20x64xf32, #tpu.memory_space<vmem>>, vector<8x16x64xf32>
    %2 = vector.shape_cast %1 : vector<8x16x64xf32> to vector<128x64xf32>
    %c0_2 = arith.constant 0 : index
    %c0_3 = arith.constant 0 : index
    %c0_4 = arith.constant 0 : index
    %3 = vector.load %arg2[%c0_2, %c0_3, %c0_4] : memref<5x64x128xf32, #tpu.memory_space<vmem>>, vector<1x64x128xf32>
    %4 = vector.shape_cast %3 : vector<1x64x128xf32> to vector<64x128xf32>
    %cst_5 = arith.constant dense<0.000000e+00> : vector<128x128xf32>
    %5 = tpu.matmul %2, %4, %cst_5 {dimension_numbers = #tpu.dot_dimension_numbers<[1], [0], [0], [1], [0, 0, 1, 1], [], []>} : vector<128x64xf32>, vector<64x128xf32>, vector<128x128xf32> -> vector<128x128xf32>
    %6 = arith.addf %0, %5 : vector<128x128xf32>
    %c0_6 = arith.constant 0 : index
    %c1 = arith.constant 1 : index
    %c0_7 = arith.constant 0 : index
    %7 = vector.load %arg1[%c0_6, %c1, %c0_7] : memref<8x20x64xf32, #tpu.memory_space<vmem>>, vector<8x16x64xf32>
    %8 = vector.shape_cast %7 : vector<8x16x64xf32> to vector<128x64xf32>
    %c1_8 = arith.constant 1 : index
    %c0_9 = arith.constant 0 : index
    %c0_10 = arith.constant 0 : index
    %9 = vector.load %arg2[%c1_8, %c0_9, %c0_10] : memref<5x64x128xf32, #tpu.memory_space<vmem>>, vector<1x64x128xf32>
    %10 = vector.shape_cast %9 : vector<1x64x128xf32> to vector<64x128xf32>
    %cst_11 = arith.constant dense<0.000000e+00> : vector<128x128xf32>
    %11 = tpu.matmul %8, %10, %cst_11 {dimension_numbers = #tpu.dot_dimension_numbers<[1], [0], [0], [1], [0, 0, 1, 1], [], []>} : vector<128x64xf32>, vector<64x128xf32>, vector<128x128xf32> -> vector<128x128xf32>
    %12 = arith.addf %6, %11 : vector<128x128xf32>
    %c0_12 = arith.constant 0 : index
    %c2 = arith.constant 2 : index
    %c0_13 = arith.constant 0 : index
    %13 = vector.load %arg1[%c0_12, %c2, %c0_13] : memref<8x20x64xf32, #tpu.memory_space<vmem>>, vector<8x16x64xf32>
    %14 = vector.shape_cast %13 : vector<8x16x64xf32> to vector<128x64xf32>
    %c2_14 = arith.constant 2 : index
    %c0_15 = arith.constant 0 : index
    %c0_16 = arith.constant 0 : index
    %15 = vector.load %arg2[%c2_14, %c0_15, %c0_16] : memref<5x64x128xf32, #tpu.memory_space<vmem>>, vector<1x64x128xf32>
    %16 = vector.shape_cast %15 : vector<1x64x128xf32> to vector<64x128xf32>
    %cst_17 = arith.constant dense<0.000000e+00> : vector<128x128xf32>
    %17 = tpu.matmul %14, %16, %cst_17 {dimension_numbers = #tpu.dot_dimension_numbers<[1], [0], [0], [1], [0, 0, 1, 1], [], []>} : vector<128x64xf32>, vector<64x128xf32>, vector<128x128xf32> -> vector<128x128xf32>
    %18 = arith.addf %12, %17 : vector<128x128xf32>
    %c0_18 = arith.constant 0 : index
    %c3 = arith.constant 3 : index
    %c0_19 = arith.constant 0 : index
    %19 = vector.load %arg1[%c0_18, %c3, %c0_19] : memref<8x20x64xf32, #tpu.memory_space<vmem>>, vector<8x16x64xf32>
    %20 = vector.shape_cast %19 : vector<8x16x64xf32> to vector<128x64xf32>
    %c3_20 = arith.constant 3 : index
    %c0_21 = arith.constant 0 : index
    %c0_22 = arith.constant 0 : index
    %21 = vector.load %arg2[%c3_20, %c0_21, %c0_22] : memref<5x64x128xf32, #tpu.memory_space<vmem>>, vector<1x64x128xf32>
    %22 = vector.shape_cast %21 : vector<1x64x128xf32> to vector<64x128xf32>
    %cst_23 = arith.constant dense<0.000000e+00> : vector<128x128xf32>
    %23 = tpu.matmul %20, %22, %cst_23 {dimension_numbers = #tpu.dot_dimension_numbers<[1], [0], [0], [1], [0, 0, 1, 1], [], []>} : vector<128x64xf32>, vector<64x128xf32>, vector<128x128xf32> -> vector<128x128xf32>
    %24 = arith.addf %18, %23 : vector<128x128xf32>
    %c0_24 = arith.constant 0 : index
    %c4 = arith.constant 4 : index
    %c0_25 = arith.constant 0 : index
    %25 = vector.load %arg1[%c0_24, %c4, %c0_25] : memref<8x20x64xf32, #tpu.memory_space<vmem>>, vector<8x16x64xf32>
    %26 = vector.shape_cast %25 : vector<8x16x64xf32> to vector<128x64xf32>
    %c4_26 = arith.constant 4 : index
    %c0_27 = arith.constant 0 : index
    %c0_28 = arith.constant 0 : index
    %27 = vector.load %arg2[%c4_26, %c0_27, %c0_28] : memref<5x64x128xf32, #tpu.memory_space<vmem>>, vector<1x64x128xf32>
    %28 = vector.shape_cast %27 : vector<1x64x128xf32> to vector<64x128xf32>
    %cst_29 = arith.constant dense<0.000000e+00> : vector<128x128xf32>
    %29 = tpu.matmul %26, %28, %cst_29 {dimension_numbers = #tpu.dot_dimension_numbers<[1], [0], [0], [1], [0, 0, 1, 1], [], []>} : vector<128x64xf32>, vector<64x128xf32>, vector<128x128xf32> -> vector<128x128xf32>
    %30 = arith.addf %24, %29 : vector<128x128xf32>
    %31 = vector.shape_cast %30 : vector<128x128xf32> to vector<8x16x128xf32>
    %c0_30 = arith.constant 0 : index
    %c0_31 = arith.constant 0 : index
    %c0_32 = arith.constant 0 : index
    %32 = vector.load %arg3[%c0_30, %c0_31, %c0_32] : memref<8x16x128xf32, #tpu.memory_space<vmem>>, vector<8x16x128xf32>
    tpu.vector_store %arg3[%c0_30, %c0_31, %c0_32], %31 {strides = array<i32>} : memref<8x16x128xf32, #tpu.memory_space<vmem>>, vector<8x16x128xf32>,
    %cst_33 = arith.constant dense<0.000000e+00> : vector<128xf32>
    %33 = vector.multi_reduction <add>, %30, %cst_33 [0] : vector<128x128xf32> to vector<128xf32>
    %34 = vector.shape_cast %33 : vector<128xf32> to vector<1x128xf32>
    %c0_34 = arith.constant 0 : index
    %c0_35 = arith.constant 0 : index
    %c0_36 = arith.constant 0 : index
    %35 = vector.load %arg4[%c0_34, %c0_35, %c0_36] : memref<1x2x128xf32, #tpu.memory_space<vmem>>, vector<1x1x128xf32>
    %36 = vector.shape_cast %35 : vector<1x1x128xf32> to vector<1x128xf32>
    %37 = vector.shape_cast %34 : vector<1x128xf32> to vector<1x1x128xf32>
    tpu.vector_store %arg4[%c0_34, %c0_35, %c0_36], %37 {strides = array<i32>} : memref<1x2x128xf32, #tpu.memory_space<vmem>>, vector<1x1x128xf32>,
    %38 = arith.mulf %30, %30 : vector<128x128xf32>
    %cst_37 = arith.constant dense<0.000000e+00> : vector<128xf32>
    %39 = vector.multi_reduction <add>, %38, %cst_37 [0] : vector<128x128xf32> to vector<128xf32>
    %40 = vector.shape_cast %39 : vector<128xf32> to vector<1x128xf32>
    %c0_38 = arith.constant 0 : index
    %c1_39 = arith.constant 1 : index
    %c0_40 = arith.constant 0 : index
    %41 = vector.load %arg4[%c0_38, %c1_39, %c0_40] : memref<1x2x128xf32, #tpu.memory_space<vmem>>, vector<1x1x128xf32>
    %42 = vector.shape_cast %41 : vector<1x1x128xf32> to vector<1x128xf32>
    %43 = vector.shape_cast %40 : vector<1x128xf32> to vector<1x1x128xf32>
    tpu.vector_store %arg4[%c0_38, %c1_39, %c0_40], %43 {strides = array<i32>} : memref<1x2x128xf32, #tpu.memory_space<vmem>>, vector<1x1x128xf32>,
    return
  }
  func.func @transform_0(%arg0: i32) -> (i32, i32, i32) {
    %c0_i32 = arith.constant 0 : i32
    %c0_i32_0 = arith.constant 0 : i32
    %c0_i32_1 = arith.constant 0 : i32
    return %arg0, %c0_i32, %c0_i32_0 : i32, i32, i32
  }
  func.func @transform_1(%arg0: i32) -> (i32, i32, i32) {
    %c0_i32 = arith.constant 0 : i32
    %c0_i32_0 = arith.constant 0 : i32
    %c0_i32_1 = arith.constant 0 : i32
    %c0_i32_2 = arith.constant 0 : i32
    return %c0_i32, %c0_i32_0, %c0_i32_1 : i32, i32, i32
  }
  func.func @transform_2(%arg0: i32) -> (i32, i32, i32) {
    %c0_i32 = arith.constant 0 : i32
    %c0_i32_0 = arith.constant 0 : i32
    %c0_i32_1 = arith.constant 0 : i32
    return %arg0, %c0_i32, %c0_i32_0 : i32, i32, i32
  }
  func.func @transform_3(%arg0: i32) -> (i32, i32, i32) {
    %c0_i32 = arith.constant 0 : i32
    %c0_i32_0 = arith.constant 0 : i32
    %c0_i32_1 = arith.constant 0 : i32
    return %arg0, %c0_i32, %c0_i32_0 : i32, i32, i32
  }
}

module attributes {stable_mosaic.version = 11 : i64} {
  func.func @_bn_lif_conv2_kernel(%arg0: i32, %arg1: memref<4x2x16x128xf32, #tpu.memory_space<vmem>>, %arg2: memref<4x128xf32, #tpu.memory_space<vmem>>, %arg3: memref<4x128xf32, #tpu.memory_space<vmem>>, %arg4: memref<5x128x128xf32, #tpu.memory_space<vmem>>, %arg5: memref<4x2x16x128xf32, #tpu.memory_space<vmem>>, %arg6: memref<1x2x128xf32, #tpu.memory_space<vmem>>, %arg7: memref<1x1x128xf32, #tpu.memory_space<vmem>>, %arg8: memref<8x20x128xf32, #tpu.memory_space<vmem>>) attributes {dimension_semantics = [#tpu.dimension_semantics<parallel>], iteration_bounds = array<i64: 1>, scalar_prefetch = 0 : i64, scratch_operands = 1 : i64, tpu.core_type = #tpu.core_type<tc>, window_params = [{transform_indices = @transform_0, window_bounds = array<i64: 4, 2, 16, 128>}, {pipeline_mode = #tpu.pipeline_mode<synchronous>, transform_indices = @transform_1, window_bounds = array<i64: 4, 128>}, {pipeline_mode = #tpu.pipeline_mode<synchronous>, transform_indices = @transform_2, window_bounds = array<i64: 4, 128>}, {pipeline_mode = #tpu.pipeline_mode<synchronous>, transform_indices = @transform_3, window_bounds = array<i64: 5, 128, 128>}, {transform_indices = @transform_4, window_bounds = array<i64: 4, 2, 16, 128>}, {transform_indices = @transform_5, window_bounds = array<i64: 1, 2, 128>}, {transform_indices = @transform_6, window_bounds = array<i64: 1, 1, 128>}]} {
    %cst = arith.constant 0.000000e+00 : f32
    %0 = vector.broadcast %cst : f32 to vector<8x2x128xf32>
    %c0 = arith.constant 0 : index
    %c0_0 = arith.constant 0 : index
    %c0_1 = arith.constant 0 : index
    %1 = vector.load %arg8[%c0, %c0_0, %c0_1] : memref<8x20x128xf32, #tpu.memory_space<vmem>>, vector<8x2x128xf32>
    tpu.vector_store %arg8[%c0, %c0_0, %c0_1], %0 {strides = array<i32>} : memref<8x20x128xf32, #tpu.memory_space<vmem>>, vector<8x2x128xf32>,
    %cst_2 = arith.constant 0.000000e+00 : f32
    %2 = vector.broadcast %cst_2 : f32 to vector<8x2x128xf32>
    %c0_3 = arith.constant 0 : index
    %c18 = arith.constant 18 : index
    %c0_4 = arith.constant 0 : index
    %3 = vector.load %arg8[%c0_3, %c18, %c0_4] : memref<8x20x128xf32, #tpu.memory_space<vmem>>, vector<8x2x128xf32>
    tpu.vector_store %arg8[%c0_3, %c18, %c0_4], %2 {strides = array<i32>} : memref<8x20x128xf32, #tpu.memory_space<vmem>>, vector<8x2x128xf32>,
    %cst_5 = arith.constant 0.000000e+00 : f32
    %4 = vector.broadcast %cst_5 : f32 to vector<2x16x128xf32>
    %cst_6 = arith.constant 0.000000e+00 : f32
    %5 = vector.broadcast %cst_6 : f32 to vector<2x16x128xf32>
    %c0_7 = arith.constant 0 : index
    %c0_8 = arith.constant 0 : index
    %6 = vector.load %arg2[%c0_7, %c0_8] : memref<4x128xf32, #tpu.memory_space<vmem>>, vector<1x128xf32>
    %c0_9 = arith.constant 0 : index
    %c0_10 = arith.constant 0 : index
    %7 = vector.load %arg3[%c0_9, %c0_10] : memref<4x128xf32, #tpu.memory_space<vmem>>, vector<1x128xf32>
    %c0_11 = arith.constant 0 : index
    %c0_12 = arith.constant 0 : index
    %c0_13 = arith.constant 0 : index
    %c0_14 = arith.constant 0 : index
    %8 = vector.load %arg1[%c0_11, %c0_12, %c0_13, %c0_14] : memref<4x2x16x128xf32, #tpu.memory_space<vmem>>, vector<1x2x16x128xf32>
    %9 = vector.shape_cast %8 : vector<1x2x16x128xf32> to vector<2x16x128xf32>
    %10 = vector.shape_cast %6 : vector<1x128xf32> to vector<1x1x128xf32>
    %11 = vector.broadcast %10 : vector<1x1x128xf32> to vector<2x16x128xf32>
    %12 = arith.mulf %9, %11 : vector<2x16x128xf32>
    %13 = vector.shape_cast %7 : vector<1x128xf32> to vector<1x1x128xf32>
    %14 = vector.broadcast %13 : vector<1x1x128xf32> to vector<2x16x128xf32>
    %15 = arith.addf %12, %14 : vector<2x16x128xf32>
    %16 = arith.subf %15, %4 : vector<2x16x128xf32>
    %cst_15 = arith.constant 5.000000e-01 : f32
    %17 = vector.broadcast %cst_15 : f32 to vector<2x16x128xf32>
    %18 = arith.mulf %16, %17 : vector<2x16x128xf32>
    %19 = arith.addf %4, %18 : vector<2x16x128xf32>
    %cst_16 = arith.constant 1.000000e+00 : f32
    %20 = vector.broadcast %cst_16 : f32 to vector<2x16x128xf32>
    %21 = arith.cmpf oge, %19, %20 : vector<2x16x128xf32>
    %22 = arith.extui %21 : vector<2x16x128xi1> to vector<2x16x128xi32>
    %23 = arith.sitofp %22 : vector<2x16x128xi32> to vector<2x16x128xf32>
    %cst_17 = arith.constant 1.000000e+00 : f32
    %24 = vector.broadcast %cst_17 : f32 to vector<2x16x128xf32>
    %25 = arith.subf %24, %23 : vector<2x16x128xf32>
    %26 = arith.mulf %19, %25 : vector<2x16x128xf32>
    %c0_18 = arith.constant 0 : index
    %c2 = arith.constant 2 : index
    %c0_19 = arith.constant 0 : index
    %27 = vector.load %arg8[%c0_18, %c2, %c0_19] : memref<8x20x128xf32, #tpu.memory_space<vmem>>, vector<2x16x128xf32>
    tpu.vector_store %arg8[%c0_18, %c2, %c0_19], %23 {strides = array<i32>} : memref<8x20x128xf32, #tpu.memory_space<vmem>>, vector<2x16x128xf32>,
    %28 = arith.addf %5, %23 : vector<2x16x128xf32>
    %c1 = arith.constant 1 : index
    %c0_20 = arith.constant 0 : index
    %29 = vector.load %arg2[%c1, %c0_20] : memref<4x128xf32, #tpu.memory_space<vmem>>, vector<1x128xf32>
    %c1_21 = arith.constant 1 : index
    %c0_22 = arith.constant 0 : index
    %30 = vector.load %arg3[%c1_21, %c0_22] : memref<4x128xf32, #tpu.memory_space<vmem>>, vector<1x128xf32>
    %c1_23 = arith.constant 1 : index
    %c0_24 = arith.constant 0 : index
    %c0_25 = arith.constant 0 : index
    %c0_26 = arith.constant 0 : index
    %31 = vector.load %arg1[%c1_23, %c0_24, %c0_25, %c0_26] : memref<4x2x16x128xf32, #tpu.memory_space<vmem>>, vector<1x2x16x128xf32>
    %32 = vector.shape_cast %31 : vector<1x2x16x128xf32> to vector<2x16x128xf32>
    %33 = vector.shape_cast %29 : vector<1x128xf32> to vector<1x1x128xf32>
    %34 = vector.broadcast %33 : vector<1x1x128xf32> to vector<2x16x128xf32>
    %35 = arith.mulf %32, %34 : vector<2x16x128xf32>
    %36 = vector.shape_cast %30 : vector<1x128xf32> to vector<1x1x128xf32>
    %37 = vector.broadcast %36 : vector<1x1x128xf32> to vector<2x16x128xf32>
    %38 = arith.addf %35, %37 : vector<2x16x128xf32>
    %39 = arith.subf %38, %26 : vector<2x16x128xf32>
    %cst_27 = arith.constant 5.000000e-01 : f32
    %40 = vector.broadcast %cst_27 : f32 to vector<2x16x128xf32>
    %41 = arith.mulf %39, %40 : vector<2x16x128xf32>
    %42 = arith.addf %26, %41 : vector<2x16x128xf32>
    %cst_28 = arith.constant 1.000000e+00 : f32
    %43 = vector.broadcast %cst_28 : f32 to vector<2x16x128xf32>
    %44 = arith.cmpf oge, %42, %43 : vector<2x16x128xf32>
    %45 = arith.extui %44 : vector<2x16x128xi1> to vector<2x16x128xi32>
    %46 = arith.sitofp %45 : vector<2x16x128xi32> to vector<2x16x128xf32>
    %cst_29 = arith.constant 1.000000e+00 : f32
    %47 = vector.broadcast %cst_29 : f32 to vector<2x16x128xf32>
    %48 = arith.subf %47, %46 : vector<2x16x128xf32>
    %49 = arith.mulf %42, %48 : vector<2x16x128xf32>
    %c2_30 = arith.constant 2 : index
    %c2_31 = arith.constant 2 : index
    %c0_32 = arith.constant 0 : index
    %50 = vector.load %arg8[%c2_30, %c2_31, %c0_32] : memref<8x20x128xf32, #tpu.memory_space<vmem>>, vector<2x16x128xf32>
    tpu.vector_store %arg8[%c2_30, %c2_31, %c0_32], %46 {strides = array<i32>} : memref<8x20x128xf32, #tpu.memory_space<vmem>>, vector<2x16x128xf32>,
    %51 = arith.addf %28, %46 : vector<2x16x128xf32>
    %c2_33 = arith.constant 2 : index
    %c0_34 = arith.constant 0 : index
    %52 = vector.load %arg2[%c2_33, %c0_34] : memref<4x128xf32, #tpu.memory_space<vmem>>, vector<1x128xf32>
    %c2_35 = arith.constant 2 : index
    %c0_36 = arith.constant 0 : index
    %53 = vector.load %arg3[%c2_35, %c0_36] : memref<4x128xf32, #tpu.memory_space<vmem>>, vector<1x128xf32>
    %c2_37 = arith.constant 2 : index
    %c0_38 = arith.constant 0 : index
    %c0_39 = arith.constant 0 : index
    %c0_40 = arith.constant 0 : index
    %54 = vector.load %arg1[%c2_37, %c0_38, %c0_39, %c0_40] : memref<4x2x16x128xf32, #tpu.memory_space<vmem>>, vector<1x2x16x128xf32>
    %55 = vector.shape_cast %54 : vector<1x2x16x128xf32> to vector<2x16x128xf32>
    %56 = vector.shape_cast %52 : vector<1x128xf32> to vector<1x1x128xf32>
    %57 = vector.broadcast %56 : vector<1x1x128xf32> to vector<2x16x128xf32>
    %58 = arith.mulf %55, %57 : vector<2x16x128xf32>
    %59 = vector.shape_cast %53 : vector<1x128xf32> to vector<1x1x128xf32>
    %60 = vector.broadcast %59 : vector<1x1x128xf32> to vector<2x16x128xf32>
    %61 = arith.addf %58, %60 : vector<2x16x128xf32>
    %62 = arith.subf %61, %49 : vector<2x16x128xf32>
    %cst_41 = arith.constant 5.000000e-01 : f32
    %63 = vector.broadcast %cst_41 : f32 to vector<2x16x128xf32>
    %64 = arith.mulf %62, %63 : vector<2x16x128xf32>
    %65 = arith.addf %49, %64 : vector<2x16x128xf32>
    %cst_42 = arith.constant 1.000000e+00 : f32
    %66 = vector.broadcast %cst_42 : f32 to vector<2x16x128xf32>
    %67 = arith.cmpf oge, %65, %66 : vector<2x16x128xf32>
    %68 = arith.extui %67 : vector<2x16x128xi1> to vector<2x16x128xi32>
    %69 = arith.sitofp %68 : vector<2x16x128xi32> to vector<2x16x128xf32>
    %cst_43 = arith.constant 1.000000e+00 : f32
    %70 = vector.broadcast %cst_43 : f32 to vector<2x16x128xf32>
    %71 = arith.subf %70, %69 : vector<2x16x128xf32>
    %72 = arith.mulf %65, %71 : vector<2x16x128xf32>
    %c4 = arith.constant 4 : index
    %c2_44 = arith.constant 2 : index
    %c0_45 = arith.constant 0 : index
    %73 = vector.load %arg8[%c4, %c2_44, %c0_45] : memref<8x20x128xf32, #tpu.memory_space<vmem>>, vector<2x16x128xf32>
    tpu.vector_store %arg8[%c4, %c2_44, %c0_45], %69 {strides = array<i32>} : memref<8x20x128xf32, #tpu.memory_space<vmem>>, vector<2x16x128xf32>,
    %74 = arith.addf %51, %69 : vector<2x16x128xf32>
    %c3 = arith.constant 3 : index
    %c0_46 = arith.constant 0 : index
    %75 = vector.load %arg2[%c3, %c0_46] : memref<4x128xf32, #tpu.memory_space<vmem>>, vector<1x128xf32>
    %c3_47 = arith.constant 3 : index
    %c0_48 = arith.constant 0 : index
    %76 = vector.load %arg3[%c3_47, %c0_48] : memref<4x128xf32, #tpu.memory_space<vmem>>, vector<1x128xf32>
    %c3_49 = arith.constant 3 : index
    %c0_50 = arith.constant 0 : index
    %c0_51 = arith.constant 0 : index
    %c0_52 = arith.constant 0 : index
    %77 = vector.load %arg1[%c3_49, %c0_50, %c0_51, %c0_52] : memref<4x2x16x128xf32, #tpu.memory_space<vmem>>, vector<1x2x16x128xf32>
    %78 = vector.shape_cast %77 : vector<1x2x16x128xf32> to vector<2x16x128xf32>
    %79 = vector.shape_cast %75 : vector<1x128xf32> to vector<1x1x128xf32>
    %80 = vector.broadcast %79 : vector<1x1x128xf32> to vector<2x16x128xf32>
    %81 = arith.mulf %78, %80 : vector<2x16x128xf32>
    %82 = vector.shape_cast %76 : vector<1x128xf32> to vector<1x1x128xf32>
    %83 = vector.broadcast %82 : vector<1x1x128xf32> to vector<2x16x128xf32>
    %84 = arith.addf %81, %83 : vector<2x16x128xf32>
    %85 = arith.subf %84, %72 : vector<2x16x128xf32>
    %cst_53 = arith.constant 5.000000e-01 : f32
    %86 = vector.broadcast %cst_53 : f32 to vector<2x16x128xf32>
    %87 = arith.mulf %85, %86 : vector<2x16x128xf32>
    %88 = arith.addf %72, %87 : vector<2x16x128xf32>
    %cst_54 = arith.constant 1.000000e+00 : f32
    %89 = vector.broadcast %cst_54 : f32 to vector<2x16x128xf32>
    %90 = arith.cmpf oge, %88, %89 : vector<2x16x128xf32>
    %91 = arith.extui %90 : vector<2x16x128xi1> to vector<2x16x128xi32>
    %92 = arith.sitofp %91 : vector<2x16x128xi32> to vector<2x16x128xf32>
    %c6 = arith.constant 6 : index
    %c2_55 = arith.constant 2 : index
    %c0_56 = arith.constant 0 : index
    %93 = vector.load %arg8[%c6, %c2_55, %c0_56] : memref<8x20x128xf32, #tpu.memory_space<vmem>>, vector<2x16x128xf32>
    tpu.vector_store %arg8[%c6, %c2_55, %c0_56], %92 {strides = array<i32>} : memref<8x20x128xf32, #tpu.memory_space<vmem>>, vector<2x16x128xf32>,
    %94 = arith.addf %74, %92 : vector<2x16x128xf32>
    %95 = vector.shape_cast %94 : vector<2x16x128xf32> to vector<32x128xf32>
    %cst_57 = arith.constant dense<0.000000e+00> : vector<128xf32>
    %96 = vector.multi_reduction <add>, %95, %cst_57 [0] : vector<32x128xf32> to vector<128xf32>
    %97 = vector.shape_cast %96 : vector<128xf32> to vector<1x128xf32>
    %c0_58 = arith.constant 0 : index
    %c0_59 = arith.constant 0 : index
    %c0_60 = arith.constant 0 : index
    %98 = vector.load %arg7[%c0_58, %c0_59, %c0_60] : memref<1x1x128xf32, #tpu.memory_space<vmem>>, vector<1x1x128xf32>
    %99 = vector.shape_cast %98 : vector<1x1x128xf32> to vector<1x128xf32>
    %100 = vector.shape_cast %97 : vector<1x128xf32> to vector<1x1x128xf32>
    tpu.vector_store %arg7[%c0_58, %c0_59, %c0_60], %100 {strides = array<i32>} : memref<1x1x128xf32, #tpu.memory_space<vmem>>, vector<1x1x128xf32>,
    %cst_61 = arith.constant 0.000000e+00 : f32
    %101 = vector.broadcast %cst_61 : f32 to vector<128x128xf32>
    %c0_62 = arith.constant 0 : index
    %c0_63 = arith.constant 0 : index
    %c0_64 = arith.constant 0 : index
    %102 = vector.load %arg8[%c0_62, %c0_63, %c0_64] : memref<8x20x128xf32, #tpu.memory_space<vmem>>, vector<8x16x128xf32>
    %103 = vector.shape_cast %102 : vector<8x16x128xf32> to vector<128x128xf32>
    %c0_65 = arith.constant 0 : index
    %c0_66 = arith.constant 0 : index
    %c0_67 = arith.constant 0 : index
    %104 = vector.load %arg4[%c0_65, %c0_66, %c0_67] : memref<5x128x128xf32, #tpu.memory_space<vmem>>, vector<1x128x128xf32>
    %105 = vector.shape_cast %104 : vector<1x128x128xf32> to vector<128x128xf32>
    %cst_68 = arith.constant dense<0.000000e+00> : vector<128x128xf32>
    %106 = tpu.matmul %103, %105, %cst_68 {dimension_numbers = #tpu.dot_dimension_numbers<[1], [0], [0], [1], [0, 0, 1, 1], [], []>} : vector<128x128xf32>, vector<128x128xf32>, vector<128x128xf32> -> vector<128x128xf32>
    %107 = arith.addf %101, %106 : vector<128x128xf32>
    %c0_69 = arith.constant 0 : index
    %c1_70 = arith.constant 1 : index
    %c0_71 = arith.constant 0 : index
    %108 = vector.load %arg8[%c0_69, %c1_70, %c0_71] : memref<8x20x128xf32, #tpu.memory_space<vmem>>, vector<8x16x128xf32>
    %109 = vector.shape_cast %108 : vector<8x16x128xf32> to vector<128x128xf32>
    %c1_72 = arith.constant 1 : index
    %c0_73 = arith.constant 0 : index
    %c0_74 = arith.constant 0 : index
    %110 = vector.load %arg4[%c1_72, %c0_73, %c0_74] : memref<5x128x128xf32, #tpu.memory_space<vmem>>, vector<1x128x128xf32>
    %111 = vector.shape_cast %110 : vector<1x128x128xf32> to vector<128x128xf32>
    %cst_75 = arith.constant dense<0.000000e+00> : vector<128x128xf32>
    %112 = tpu.matmul %109, %111, %cst_75 {dimension_numbers = #tpu.dot_dimension_numbers<[1], [0], [0], [1], [0, 0, 1, 1], [], []>} : vector<128x128xf32>, vector<128x128xf32>, vector<128x128xf32> -> vector<128x128xf32>
    %113 = arith.addf %107, %112 : vector<128x128xf32>
    %c0_76 = arith.constant 0 : index
    %c2_77 = arith.constant 2 : index
    %c0_78 = arith.constant 0 : index
    %114 = vector.load %arg8[%c0_76, %c2_77, %c0_78] : memref<8x20x128xf32, #tpu.memory_space<vmem>>, vector<8x16x128xf32>
    %115 = vector.shape_cast %114 : vector<8x16x128xf32> to vector<128x128xf32>
    %c2_79 = arith.constant 2 : index
    %c0_80 = arith.constant 0 : index
    %c0_81 = arith.constant 0 : index
    %116 = vector.load %arg4[%c2_79, %c0_80, %c0_81] : memref<5x128x128xf32, #tpu.memory_space<vmem>>, vector<1x128x128xf32>
    %117 = vector.shape_cast %116 : vector<1x128x128xf32> to vector<128x128xf32>
    %cst_82 = arith.constant dense<0.000000e+00> : vector<128x128xf32>
    %118 = tpu.matmul %115, %117, %cst_82 {dimension_numbers = #tpu.dot_dimension_numbers<[1], [0], [0], [1], [0, 0, 1, 1], [], []>} : vector<128x128xf32>, vector<128x128xf32>, vector<128x128xf32> -> vector<128x128xf32>
    %119 = arith.addf %113, %118 : vector<128x128xf32>
    %c0_83 = arith.constant 0 : index
    %c3_84 = arith.constant 3 : index
    %c0_85 = arith.constant 0 : index
    %120 = vector.load %arg8[%c0_83, %c3_84, %c0_85] : memref<8x20x128xf32, #tpu.memory_space<vmem>>, vector<8x16x128xf32>
    %121 = vector.shape_cast %120 : vector<8x16x128xf32> to vector<128x128xf32>
    %c3_86 = arith.constant 3 : index
    %c0_87 = arith.constant 0 : index
    %c0_88 = arith.constant 0 : index
    %122 = vector.load %arg4[%c3_86, %c0_87, %c0_88] : memref<5x128x128xf32, #tpu.memory_space<vmem>>, vector<1x128x128xf32>
    %123 = vector.shape_cast %122 : vector<1x128x128xf32> to vector<128x128xf32>
    %cst_89 = arith.constant dense<0.000000e+00> : vector<128x128xf32>
    %124 = tpu.matmul %121, %123, %cst_89 {dimension_numbers = #tpu.dot_dimension_numbers<[1], [0], [0], [1], [0, 0, 1, 1], [], []>} : vector<128x128xf32>, vector<128x128xf32>, vector<128x128xf32> -> vector<128x128xf32>
    %125 = arith.addf %119, %124 : vector<128x128xf32>
    %c0_90 = arith.constant 0 : index
    %c4_91 = arith.constant 4 : index
    %c0_92 = arith.constant 0 : index
    %126 = vector.load %arg8[%c0_90, %c4_91, %c0_92] : memref<8x20x128xf32, #tpu.memory_space<vmem>>, vector<8x16x128xf32>
    %127 = vector.shape_cast %126 : vector<8x16x128xf32> to vector<128x128xf32>
    %c4_93 = arith.constant 4 : index
    %c0_94 = arith.constant 0 : index
    %c0_95 = arith.constant 0 : index
    %128 = vector.load %arg4[%c4_93, %c0_94, %c0_95] : memref<5x128x128xf32, #tpu.memory_space<vmem>>, vector<1x128x128xf32>
    %129 = vector.shape_cast %128 : vector<1x128x128xf32> to vector<128x128xf32>
    %cst_96 = arith.constant dense<0.000000e+00> : vector<128x128xf32>
    %130 = tpu.matmul %127, %129, %cst_96 {dimension_numbers = #tpu.dot_dimension_numbers<[1], [0], [0], [1], [0, 0, 1, 1], [], []>} : vector<128x128xf32>, vector<128x128xf32>, vector<128x128xf32> -> vector<128x128xf32>
    %131 = arith.addf %125, %130 : vector<128x128xf32>
    %132 = vector.shape_cast %131 : vector<128x128xf32> to vector<4x2x16x128xf32>
    %c0_97 = arith.constant 0 : index
    %c0_98 = arith.constant 0 : index
    %c0_99 = arith.constant 0 : index
    %c0_100 = arith.constant 0 : index
    %133 = vector.load %arg5[%c0_97, %c0_98, %c0_99, %c0_100] : memref<4x2x16x128xf32, #tpu.memory_space<vmem>>, vector<4x2x16x128xf32>
    tpu.vector_store %arg5[%c0_97, %c0_98, %c0_99, %c0_100], %132 {strides = array<i32>} : memref<4x2x16x128xf32, #tpu.memory_space<vmem>>, vector<4x2x16x128xf32>,
    %cst_101 = arith.constant dense<0.000000e+00> : vector<128xf32>
    %134 = vector.multi_reduction <add>, %131, %cst_101 [0] : vector<128x128xf32> to vector<128xf32>
    %135 = vector.shape_cast %134 : vector<128xf32> to vector<1x128xf32>
    %c0_102 = arith.constant 0 : index
    %c0_103 = arith.constant 0 : index
    %c0_104 = arith.constant 0 : index
    %136 = vector.load %arg6[%c0_102, %c0_103, %c0_104] : memref<1x2x128xf32, #tpu.memory_space<vmem>>, vector<1x1x128xf32>
    %137 = vector.shape_cast %136 : vector<1x1x128xf32> to vector<1x128xf32>
    %138 = vector.shape_cast %135 : vector<1x128xf32> to vector<1x1x128xf32>
    tpu.vector_store %arg6[%c0_102, %c0_103, %c0_104], %138 {strides = array<i32>} : memref<1x2x128xf32, #tpu.memory_space<vmem>>, vector<1x1x128xf32>,
    %139 = arith.mulf %131, %131 : vector<128x128xf32>
    %cst_105 = arith.constant dense<0.000000e+00> : vector<128xf32>
    %140 = vector.multi_reduction <add>, %139, %cst_105 [0] : vector<128x128xf32> to vector<128xf32>
    %141 = vector.shape_cast %140 : vector<128xf32> to vector<1x128xf32>
    %c0_106 = arith.constant 0 : index
    %c1_107 = arith.constant 1 : index
    %c0_108 = arith.constant 0 : index
    %142 = vector.load %arg6[%c0_106, %c1_107, %c0_108] : memref<1x2x128xf32, #tpu.memory_space<vmem>>, vector<1x1x128xf32>
    %143 = vector.shape_cast %142 : vector<1x1x128xf32> to vector<1x128xf32>
    %144 = vector.shape_cast %141 : vector<1x128xf32> to vector<1x1x128xf32>
    tpu.vector_store %arg6[%c0_106, %c1_107, %c0_108], %144 {strides = array<i32>} : memref<1x2x128xf32, #tpu.memory_space<vmem>>, vector<1x1x128xf32>,
    return
  }
  func.func @transform_0(%arg0: i32) -> (i32, i32, i32, i32) {
    %c0_i32 = arith.constant 0 : i32
    %c0_i32_0 = arith.constant 0 : i32
    %c0_i32_1 = arith.constant 0 : i32
    %c0_i32_2 = arith.constant 0 : i32
    return %c0_i32, %arg0, %c0_i32_0, %c0_i32_1 : i32, i32, i32, i32
  }
  func.func @transform_1(%arg0: i32) -> (i32, i32) {
    %c0_i32 = arith.constant 0 : i32
    %c0_i32_0 = arith.constant 0 : i32
    %c0_i32_1 = arith.constant 0 : i32
    return %c0_i32, %c0_i32_0 : i32, i32
  }
  func.func @transform_2(%arg0: i32) -> (i32, i32) {
    %c0_i32 = arith.constant 0 : i32
    %c0_i32_0 = arith.constant 0 : i32
    %c0_i32_1 = arith.constant 0 : i32
    return %c0_i32, %c0_i32_0 : i32, i32
  }
  func.func @transform_3(%arg0: i32) -> (i32, i32, i32) {
    %c0_i32 = arith.constant 0 : i32
    %c0_i32_0 = arith.constant 0 : i32
    %c0_i32_1 = arith.constant 0 : i32
    %c0_i32_2 = arith.constant 0 : i32
    return %c0_i32, %c0_i32_0, %c0_i32_1 : i32, i32, i32
  }
  func.func @transform_4(%arg0: i32) -> (i32, i32, i32, i32) {
    %c0_i32 = arith.constant 0 : i32
    %c0_i32_0 = arith.constant 0 : i32
    %c0_i32_1 = arith.constant 0 : i32
    %c0_i32_2 = arith.constant 0 : i32
    return %c0_i32, %arg0, %c0_i32_0, %c0_i32_1 : i32, i32, i32, i32
  }
  func.func @transform_5(%arg0: i32) -> (i32, i32, i32) {
    %c0_i32 = arith.constant 0 : i32
    %c0_i32_0 = arith.constant 0 : i32
    %c0_i32_1 = arith.constant 0 : i32
    return %arg0, %c0_i32, %c0_i32_0 : i32, i32, i32
  }
  func.func @transform_6(%arg0: i32) -> (i32, i32, i32) {
    %c0_i32 = arith.constant 0 : i32
    %c0_i32_0 = arith.constant 0 : i32
    %c0_i32_1 = arith.constant 0 : i32
    return %arg0, %c0_i32, %c0_i32_0 : i32, i32, i32
  }
}

</mosaic_0001>

<bundles_post_ra>
// kernel: tile.14
= control target key start
LH: loop header
LB: loop body
LE: loop exit
PB: predicated region body
PF: predicated region fallthrough
CT: control target
= control target key end

     0   :  { %vm6_vm0 = vcmask 1043458   ;;  %s11_s6 = smov 3  ;;  %s14_s7 = smov 12  ;;  %vm8_vm1 = vcmask 64512   ;;  %vm20_vm2 = vcmask 1048512   ;;  %vm32_vm3 = vcmask 982912   ;;  %s383_s0 = inlined_call_operand.vmem [shape: f32[4,16,8], index: 0, kind: input, shape index: {}]   ;;  %s384_s1 = inlined_call_operand.vmem [shape: f32[4,128], index: 1, kind: output, shape index: {}]  }
   0x1   :  { %v198_v0 = vld [vmem:[%s383_s0 + $0xf] ss:$16 sm:%s11_s6]   ;;  %s35_s12 = smov 3  ;;  %s38_s15 = smov 12  ;;  %vm44_vm4 = vcmask 917312   ;;  %vm56_vm5 = vcmask 851712  }
   0x2   :  { %v199_v1 = vld [vmem:[%s383_s0 + $0xf] ss:$16 sm:%s14_s7]   ;;  %v202_v3 = vld [vmem:[%s383_s0 + $0xd] ss:$16 sm:%s35_s12]   ;;  %s243_s16 = smov 120   ;;  %s23_s19 = smov 3 }
   0x3   :  { %v17_v2 = vsel %vm6_vm0, %v199_v1, %v198_v0  ;;  %v203_v4 = vld [vmem:[%s383_s0 + $0xd] ss:$16 sm:%s38_s15]   ;;  %s26_s20 = smov 12  ;;  %v200_v6 = vld [vmem:[%s383_s0 + $0xe] ss:$16 sm:%s23_s19]   ;;  %s47_s25 = smov 3 }
   0x4   :  { %18 = vrot.lane.b32.xlu0 %v17_v2, %s243_s16  ;;  %v41_v5 = vsel %vm6_vm0, %v203_v4, %v202_v3  ;;  %v201_v7 = vld [vmem:[%s383_s0 + $0xe] ss:$16 sm:%s26_s20]   ;;  %s244_s26 = smov 104   ;;  %s50_s29 = smov 12  ;;  %vm68_vm6 = vcmask 786112   ;;  %vm80_vm7 = vcmask 720512  }
   0x5   :  { %42 = vrot.lane.b32.xlu1 %v41_v5, %s244_s26  ;;  %v29_v8 = vsel %vm6_vm0, %v201_v7, %v200_v6  ;;  %v204_v9 = vld [vmem:[%s383_s0 + $0xc] ss:$16 sm:%s47_s25]   ;;  %s59_s3 = smov 3  ;;  %s62_s4 = smov 12  ;;  %vm92_vm8 = vcmask 654912   ;;  %vm104_vm9 = vcmask 589312  }
   0x6   :  { %v205_v10 = vld [vmem:[%s383_s0 + $0xc] ss:$16 sm:%s50_s29]   ;;  %s245_s5 = smov 112   ;;  %v206_v12 = vld [vmem:[%s383_s0 + $0xb] ss:$16 sm:%s59_s3]   ;;  %s71_s8 = smov 3 }
   0x7   :  { %v53_v11 = vsel %vm6_vm0, %v205_v10, %v204_v9  ;;  %v207_v13 = vld [vmem:[%s383_s0 + $0xb] ss:$16 sm:%s62_s4]   ;;  %v208_v14 = vld [vmem:[%s383_s0 + $0xa] ss:$16 sm:%s71_s8]   ;;  %s74_s13 = smov 12  ;;  %s246_s14 = smov 96  }
   0x8   :  { %30 = vrot.lane.b32.xlu0 %v29_v8, %s245_s5  ;;  %v65_v15 = vsel %vm6_vm0, %v207_v13, %v206_v12  ;;  %v209_v16 = vld [vmem:[%s383_s0 + $0xa] ss:$16 sm:%s74_s13]   ;;  %s83_s17 = smov 3  ;;  %s86_s18 = smov 12  ;;  %vm116_vm10 = vcmask 523712   ;;  %vm128_vm11 = vcmask 458112  }
   0x9   :  { %54 = vrot.lane.b32.xlu1 %v53_v11, %s246_s14  ;;  %v77_v17 = vsel %vm6_vm0, %v209_v16, %v208_v14  ;;  %v210_v18 = vld [vmem:[%s383_s0 + $0x9] ss:$16 sm:%s83_s17]   ;;  %s95_s23 = smov 3  ;;  %s247_s24 = smov 88   ;;  %vm140_vm12 = vcmask 392512   ;;  %vm152_vm13 = vcmask 326912  }
   0xa   :  { %v211_v19 = vld [vmem:[%s383_s0 + $0x9] ss:$16 sm:%s86_s18]   ;;  %v212_v20 = vld [vmem:[%s383_s0 + $0x8] ss:$16 sm:%s95_s23]   ;;  %s98_s27 = smov 12  ;;  %s107_s30 = smov 3 }
   0xb   :  { %v89_v21 = vsel %vm6_vm0, %v211_v19, %v210_v18  ;;  %v213_v22 = vld [vmem:[%s383_s0 + $0x8] ss:$16 sm:%s98_s27]   ;;  %s110_s2 = smov 12  ;;  %s248_s3 = smov 80   ;;  %v214_v23 = vld [vmem:[%s383_s0 + $0x7] ss:$16 sm:%s107_s30]  }
   0xc   :  { %66 = vrot.lane.b32.xlu0 %v65_v15, %s247_s24  ;;  %s119_s6 = smov 3  ;;  %v101_v24 = vsel %vm6_vm0, %v213_v22, %v212_v20  ;;  %v215_v25 = vld [vmem:[%s383_s0 + $0x7] ss:$16 sm:%s110_s2]   ;;  %s122_s11 = smov 12  ;;  %vm164_vm14 = vcmask 261312   ;;  %vm176_vm15 = vcmask 195712  }
   0xd   :  { %78 = vrot.lane.b32.xlu1 %v77_v17, %s248_s3  ;;  %v216_v26 = vld [vmem:[%s383_s0 + $0x6] ss:$16 sm:%s119_s6]   ;;  %s249_s12 = smov 72   ;;  %s131_s15 = smov 3  ;;  %v113_v28 = vsel %vm6_vm0, %v215_v25, %v214_v23 }
   0xe   :  { %v217_v27 = vld [vmem:[%s383_s0 + $0x6] ss:$16 sm:%s122_s11]   ;;  %s134_s16 = smov 12  ;;  %v218_v29 = vld [vmem:[%s383_s0 + $0x5] ss:$16 sm:%s131_s15]   ;;  %s143_s19 = smov 3 }
   0xf   :  { %s250_s20 = smov 64   ;;  %v219_v30 = vld [vmem:[%s383_s0 + $0x5] ss:$16 sm:%s134_s16]   ;;  %s146_s23 = smov 12  ;;  %v125_v31 = vsel %vm6_vm0, %v217_v27, %v216_v26  ;;  %v220_v32 = vld [vmem:[%s383_s0 + $0x4] ss:$16 sm:%s143_s19]  }
  0x10   :  { %90 = vrot.lane.b32.xlu0 %v89_v21, %s249_s12  ;;  %s155_s26 = smov 3  ;;  %s158_s27 = smov 12  ;;  %v221_v33 = vld [vmem:[%s383_s0 + $0x4] ss:$16 sm:%s146_s23]   ;;  %v137_v34 = vsel %vm6_vm0, %v219_v30, %v218_v29 }
  0x11   :  { %102 = vrot.lane.b32.xlu1 %v101_v24, %s250_s20  ;;  %s251_s28 = smov 56   ;;  %s167_s2 = smov 3  ;;  %v222_v35 = vld [vmem:[%s383_s0 + $0x3] ss:$16 sm:%s155_s26]   ;;  %v149_v37 = vsel %vm6_vm0, %v221_v33, %v220_v32 }
  0x12   :  { %s170_s5 = smov 12  ;;  %s252_s6 = smov 48   ;;  %v223_v36 = vld [vmem:[%s383_s0 + $0x3] ss:$16 sm:%s158_s27]   ;;  %v224_v38 = vld [vmem:[%s383_s0 + $0x2] ss:$16 sm:%s167_s2]  }
  0x13   :  { %s179_s9 = smov 3  ;;  %v225_v39 = vld [vmem:[%s383_s0 + $0x2] ss:$16 sm:%s170_s5]   ;;  %s182_s14 = smov 12  ;;  %v161_v41 = vsel %vm6_vm0, %v223_v36, %v222_v35 }
  0x14   :  { %114 = vrot.lane.b32.xlu0 %v113_v28, %s251_s28  ;;  %s2_s15 = smov 3  ;;  %s253_s16 = smov 40   ;;  %v226_v42 = vld [vmem:[%s383_s0 + $0x1] ss:$16 sm:%s179_s9]   ;;  %v173_v46 = vsel %vm6_vm0, %v225_v39, %v224_v38 }
  0x15   :  { %126 = vrot.lane.b32.xlu1 %v125_v31, %s252_s6  ;;  %v3_v40 = vld [vmem:[%s383_s0] ss:$16 sm:%s2_s15]   ;;  %s4_s19 = smov 12  ;;  %s254_s24 = smov 32  }
  0x16   :  { %v5_v43 = vld [vmem:[%s383_s0] ss:$16 sm:%s4_s19]   ;;  %v227_v44 = vld [vmem:[%s383_s0 + $0x1] ss:$16 sm:%s182_s14]   ;;  %s255_s0 = smov 24   ;;  %s256_s27 = smov 16  }
  0x17   :  { %v7_v45 = vsel %vm6_vm0, %v5_v43, %v3_v40  ;;  %v185_v47 = vsel %vm6_vm0, %v227_v44, %v226_v42  ;;  %s257_s28 = smov 8   ;;  %vm188_vm0 = vcmask 130112  }
  0x18   :  { %138 = vrot.lane.b32.xlu0 %v137_v34, %s253_s16  ;;  %9 = vst.msk [vmem:[#allocation0] sm:$0xf] %vm8_vm1, %v7_v45  }
  0x19   :  { %150 = vrot.lane.b32.xlu1 %v149_v37, %s254_s24 }
  0x1c   :  { %162 = vrot.lane.b32.xlu0 %v161_v41, %s255_s0 }
  0x1d   :  { %174 = vrot.lane.b32.xlu1 %v173_v46, %s256_s27 }
  0x20   :  { %186 = vrot.lane.b32.xlu0 %v185_v47, %s257_s28 }
  0x76   :  { %v19_v48 = vpop.permute.xlu0 %18  }
  0x77   :  { %21 = vst.msk [vmem:[#allocation0] sm:$0xf] %vm20_vm2, %v19_v48   ;;  %v43_v49 = vpop.permute.xlu1 %42  }
  0x7a   :  { %v31_v50 = vpop.permute.xlu0 %30  }
  0x7b   :  { %33 = vst.msk [vmem:[#allocation0] sm:$0xf] %vm32_vm3, %v31_v50   ;;  %v55_v51 = vpop.permute.xlu1 %54  }
  0x7c   :  { %45 = vst.msk [vmem:[#allocation0] sm:$0xf] %vm44_vm4, %v43_v49  }
  0x7d   :  { %57 = vst.msk [vmem:[#allocation0] sm:$0xf] %vm56_vm5, %v55_v51  }
  0x7e   :  { %v67_v52 = vpop.permute.xlu0 %66  }
  0x7f   :  { %69 = vst.msk [vmem:[#allocation0] sm:$0xf] %vm68_vm6, %v67_v52   ;;  %v79_v53 = vpop.permute.xlu1 %78  }
  0x80   :  { %81 = vst.msk [vmem:[#allocation0] sm:$0xf] %vm80_vm7, %v79_v53  }
  0x82   :  { %v91_v54 = vpop.permute.xlu0 %90  }
  0x83   :  { %93 = vst.msk [vmem:[#allocation0] sm:$0xf] %vm92_vm8, %v91_v54   ;;  %v103_v55 = vpop.permute.xlu1 %102  }
  0x84   :  { %105 = vst.msk [vmem:[#allocation0] sm:$0xf] %vm104_vm9, %v103_v55  }
  0x86   :  { %v115_v56 = vpop.permute.xlu0 %114  }
  0x87   :  { %117 = vst.msk [vmem:[#allocation0] sm:$0xf] %vm116_vm10, %v115_v56   ;;  %v127_v57 = vpop.permute.xlu1 %126  }
  0x88   :  { %129 = vst.msk [vmem:[#allocation0] sm:$0xf] %vm128_vm11, %v127_v57  }
  0x8a   :  { %v139_v58 = vpop.permute.xlu0 %138  }
  0x8b   :  { %141 = vst.msk [vmem:[#allocation0] sm:$0xf] %vm140_vm12, %v139_v58   ;;  %v151_v59 = vpop.permute.xlu1 %150  }
  0x8c   :  { %153 = vst.msk [vmem:[#allocation0] sm:$0xf] %vm152_vm13, %v151_v59  }
  0x8e   :  { %v163_v60 = vpop.permute.xlu0 %162  }
  0x8f   :  { %165 = vst.msk [vmem:[#allocation0] sm:$0xf] %vm164_vm14, %v163_v60   ;;  %v175_v61 = vpop.permute.xlu1 %174  }
  0x90   :  { %177 = vst.msk [vmem:[#allocation0] sm:$0xf] %vm176_vm15, %v175_v61  }
  0x92   :  { %v187_v62 = vpop.permute.xlu0 %186  }
  0x93   :  { %189 = vst.msk [vmem:[#allocation0] sm:$0xf] %vm188_vm0, %v187_v62  }
  0x9a   :  { %v194_v63 = vld [vmem:[#allocation0] sm:$0xf] }
  0x9b   :  { %197 = vst [vmem:[%s384_s1] sm:$0xf] %v194_v63 }

// kernel: sew_rdb_forward.2
= control target key start
LH: loop header
LB: loop body
LE: loop exit
PB: predicated region body
PF: predicated region fallthrough
CT: control target
= control target key end

     0   :  { %vm62_vm0 = vcmask 523264   ;;  %s2278_s1 = inlined_call_operand.vmem [shape: f32[5,64,128], index: 1, kind: input, shape index: {}]   ;;  %s2279_s0 = inlined_call_operand.vmem [shape: f32[8,20,64], index: 0, kind: input, shape index: {}]   ;;  %s2280_s2 = inlined_call_operand.vmem [shape: f32[8,16,128], index: 2, kind: output, shape index: {0}]   ;;  %s2281_s3 = inlined_call_operand.vmem [shape: f32[1,2,128], index: 3, kind: output, shape index: {1}]  }
   0x1   :  { %v1242_v0 = vld [vmem:[%s2278_s1 + $0x78] sm:$0xff]  ;;  %v1241_v1 = vld [vmem:[%s2278_s1 + $0x70] sm:$0xff]  ;;  %v1240_v2 = vld [vmem:[%s2278_s1 + $0x68] sm:$0xff] }
   0x2   :  { %1667 = vmatprep.subr.mxu1 %v1242_v0  ;;  %1467 = vmatprep.subr.mxu0 %v1242_v0  ;;  %v1239_v3 = vld [vmem:[%s2278_s1 + $0x60] sm:$0xff]  ;;  %v1238_v4 = vld [vmem:[%s2278_s1 + $0x58] sm:$0xff]  ;;  %v1237_v5 = vld [vmem:[%s2278_s1 + $0x50] sm:$0xff] }
   0x3   :  { %1675 = vmatpush3.msra.mxu1 %v1242_v0  ;;  %1468 = vmatpush3.msra.mxu0 %v1242_v0  ;;  %v1236_v6 = vld [vmem:[%s2278_s1 + $0x48] sm:$0xff]  ;;  %v1235_v7 = vld [vmem:[%s2278_s1 + $0x40] sm:$0xff]  ;;  %v36_v11 = vld [vmem:[%s2278_s1 + $0x38] sm:$0xff] }
   0x4   :  { %1668 = vmatprep.subr.mxu1 %v1241_v1  ;;  %1469 = vmatprep.subr.mxu0 %v1241_v1  ;;  %v45_v8 = vld [vmem:[%s2279_s0 + $0x61] sm:$0xff]  ;;  %v46_v10 = vld [vmem:[%s2279_s0 + $0x69] sm:$0xff]  ;;  %v1282_v13 = vld [vmem:[%s2278_s1 + $0xb8] sm:$0xff] }
   0x5   :  { %1676 = vmatpush3.msra.mxu1 %v1241_v1  ;;  %1470 = vmatpush3.msra.mxu0 %v1241_v1  ;;  %v37_v9 = vld [vmem:[%s2279_s0 + $0x1] sm:$0xff]  ;;  %v38_v12 = vld [vmem:[%s2279_s0 + $0x9] sm:$0xff]  ;;  %v47_v15 = vld [vmem:[%s2279_s0 + $0x79] sm:$0xff] }
   0x6   :  { %1669 = vmatprep.subr.mxu1 %v1240_v2  ;;  %1471 = vmatprep.subr.mxu0 %v1240_v2  ;;  %v35_v14 = vld [vmem:[%s2278_s1 + $0x30] sm:$0xff]  ;;  %v39_v17 = vld [vmem:[%s2279_s0 + $0x19] sm:$0xff]  ;;  %v48_v18 = vld [vmem:[%s2279_s0 + $0x81] sm:$0xff] }
   0x7   :  { %1677 = vmatpush3.msra.mxu1 %v1240_v2  ;;  %1472 = vmatpush3.msra.mxu0 %v1240_v2  ;;  %v1281_v16 = vld [vmem:[%s2278_s1 + $0xb0] sm:$0xff]  ;;  %v34_v19 = vld [vmem:[%s2278_s1 + $0x28] sm:$0xff]  ;;  %v33_v22 = vld [vmem:[%s2278_s1 + $0x20] sm:$0xff] }
   0x8   :  { %1670 = vmatprep.subr.mxu1 %v1239_v3  ;;  %1473 = vmatprep.subr.mxu0 %v1239_v3  ;;  %v40_v20 = vld [vmem:[%s2279_s0 + $0x21] sm:$0xff]  ;;  %v49_v23 = vld [vmem:[%s2279_s0 + $0x91] sm:$0xff]  ;;  %v50_v26 = vld [vmem:[%s2279_s0 + $0x99] sm:$0xff] }
   0x9   :  { %1678 = vmatpush3.msra.mxu1 %v1239_v3  ;;  %1474 = vmatpush3.msra.mxu0 %v1239_v3  ;;  %v1280_v21 = vld [vmem:[%s2278_s1 + $0xa8] sm:$0xff]  ;;  %v1279_v24 = vld [vmem:[%s2278_s1 + $0xa0] sm:$0xff]  ;;  %v41_v25 = vld [vmem:[%s2279_s0 + $0x31] sm:$0xff] }
   0xa   :  { %1671 = vmatprep.subr.mxu1 %v1238_v4  ;;  %1475 = vmatprep.subr.mxu0 %v1238_v4  ;;  %v32_v27 = vld [vmem:[%s2278_s1 + $0x18] sm:$0xff]  ;;  %v31_v30 = vld [vmem:[%s2278_s1 + $0x10] sm:$0xff]  ;;  %v30_v35 = vld [vmem:[%s2278_s1 + $0x8] sm:$0xff] }
   0xb   :  { %1679 = vmatpush3.msra.mxu1 %v1238_v4  ;;  %1476 = vmatpush3.msra.mxu0 %v1238_v4  ;;  %v42_v28 = vld [vmem:[%s2279_s0 + $0x39] sm:$0xff]  ;;  %v51_v31 = vld [vmem:[%s2279_s0 + $0xa9] sm:$0xff]  ;;  %v52_v34 = vld [vmem:[%s2279_s0 + $0xb1] sm:$0xff] }
   0xc   :  { %1672 = vmatprep.subr.mxu1 %v1237_v5  ;;  %1477 = vmatprep.subr.mxu0 %v1237_v5  ;;  %v1278_v29 = vld [vmem:[%s2278_s1 + $0x98] sm:$0xff]  ;;  %v1277_v32 = vld [vmem:[%s2278_s1 + $0x90] sm:$0xff]  ;;  %v1276_v37 = vld [vmem:[%s2278_s1 + $0x88] sm:$0xff] }
   0xd   :  { %1680 = vmatpush3.msra.mxu1 %v1237_v5  ;;  %1478 = vmatpush3.msra.mxu0 %v1237_v5  ;;  %v43_v33 = vld [vmem:[%s2279_s0 + $0x49] sm:$0xff]  ;;  %v44_v36 = vld [vmem:[%s2279_s0 + $0x51] sm:$0xff]  ;;  %v29_v38 = vld [vmem:[%s2278_s1] sm:$0xff] }
   0xe   :  { %1673 = vmatprep.subr.mxu1 %v1236_v6  ;;  %1479 = vmatprep.subr.mxu0 %v1236_v6  ;;  %v13_v39 = vld [vmem:[%s2279_s0] sm:$0xff]  ;;  %v14_v41 = vld [vmem:[%s2279_s0 + $0x8] sm:$0xff]  ;;  %v1306_v43 = vld [vmem:[%s2278_s1 + $0xf8] sm:$0xff] }
   0xf   :  { %1681 = vmatpush3.msra.mxu1 %v1236_v6  ;;  %1480 = vmatpush3.msra.mxu0 %v1236_v6  ;;  %v1275_v40 = vld [vmem:[%s2278_s1 + $0x80] sm:$0xff]  ;;  %v450_v44 = vld [vmem:[%s2279_s0 + $0xa] sm:$0xff]  ;;  %v1330_v45 = vld [vmem:[%s2278_s1 + $0x138] sm:$0xff] }
  0x10   :  { %1674 = vmatprep.subr.mxu1 %v1235_v7  ;;  %1481 = vmatprep.subr.mxu0 %v1235_v7  ;;  %v449_v42 = vld [vmem:[%s2279_s0 + $0x2] sm:$0xff]  ;;  %v15_v46 = vld [vmem:[%s2279_s0 + $0x18] sm:$0xff]  ;;  %v1305_v49 = vld [vmem:[%s2278_s1 + $0xf0] sm:$0xff] }
  0x11   :  { %1682 = vmatpush3.msra.mxu1 %v1235_v7  ;;  %1495 = vmatprep.mubr.msk.f32.mxu1 %vm62_vm0, %v45_v8  ;;  %v16_v47 = vld [vmem:[%s2279_s0 + $0x20] sm:$0xff]  ;;  %v1329_v51 = vld [vmem:[%s2278_s1 + $0x130] sm:$0xff]  ;;  %v18_v53 = vld [vmem:[%s2279_s0 + $0x38] sm:$0xff] }
  0x12   :  { %1482 = vmatpush3.msra.mxu0 %v1235_v7  ;;  %1483 = vmatprep.mubr.msk.f32.mxu0 %vm62_vm0, %v37_v9  ;;  %v451_v48 = vld [vmem:[%s2279_s0 + $0x1a] sm:$0xff]  ;;  %v452_v50 = vld [vmem:[%s2279_s0 + $0x22] sm:$0xff]  ;;  %v17_v52 = vld [vmem:[%s2279_s0 + $0x30] sm:$0xff] }
  0x13   :  { %1496 = vmatmul.mubr.msk.f32.vlgmr.msra.gmra.mxu1 %vm62_vm0, %v46_v10  ;;  %1507 = vmatprep.subr.mxu1 %v36_v11  ;;  %v453_v54 = vld [vmem:[%s2279_s0 + $0x32] sm:$0xff]  ;;  %v1304_v55 = vld [vmem:[%s2278_s1 + $0xe8] sm:$0xff]  ;;  %v454_v56 = vld [vmem:[%s2279_s0 + $0x3a] sm:$0xff] }
  0x14   :  { %1484 = vmatmul.mubr.msk.f32.vlgmr.msra.gmra.mxu0 %vm62_vm0, %v38_v12  ;;  %1508 = vmatpush3.msra.mxu1 %v36_v11  ;;  %v1328_v57 = vld [vmem:[%s2278_s1 + $0x128] sm:$0xff]  ;;  %v20_v59 = vld [vmem:[%s2279_s0 + $0x50] sm:$0xff]  ;;  %v1303_v61 = vld [vmem:[%s2278_s1 + $0xe0] sm:$0xff] }
  0x15   :  { %1547 = vmatprep.subr.mxu0 %v1282_v13  ;;  %1509 = vmatprep.subr.mxu1 %v35_v14  ;;  %v19_v58 = vld [vmem:[%s2279_s0 + $0x48] sm:$0xff]  ;;  %v456_v62 = vld [vmem:[%s2279_s0 + $0x52] sm:$0xff]  ;;  %v1327_v63 = vld [vmem:[%s2278_s1 + $0x120] sm:$0xff] }
  0x16   :  { %1548 = vmatpush3.msra.mxu0 %v1282_v13  ;;  %1498 = vmatprep.mubr.msk.f32.mxu1 %vm62_vm0, %v47_v15  ;;  %v455_v60 = vld [vmem:[%s2279_s0 + $0x4a] sm:$0xff]  ;;  %v21_v0 = vld [vmem:[%s2279_s0 + $0x60] sm:$0xff]  ;;  %v1302_v3 = vld [vmem:[%s2278_s1 + $0xd8] sm:$0xff] }
  0x17   :  { %1510 = vmatpush3.msra.mxu1 %v35_v14  ;;  %1549 = vmatprep.subr.mxu0 %v1281_v16  ;;  %v22_v1 = vld [vmem:[%s2279_s0 + $0x68] sm:$0xff]  ;;  %v1326_v5 = vld [vmem:[%s2278_s1 + $0x118] sm:$0xff]  ;;  %v24_v7 = vld [vmem:[%s2279_s0 + $0x80] sm:$0xff] }
  0x18   :  { %1486 = vmatprep.mubr.msk.f32.mxu0 %vm62_vm0, %v39_v17  ;;  %1499 = vmatmul.mubr.msk.f32.gmra.mxu1 %vm62_vm0, %v48_v18  ;;  %v457_v2 = vld [vmem:[%s2279_s0 + $0x62] sm:$0xff]  ;;  %v458_v4 = vld [vmem:[%s2279_s0 + $0x6a] sm:$0xff]  ;;  %v23_v6 = vld [vmem:[%s2279_s0 + $0x78] sm:$0xff] }
  0x19   :  { %1511 = vmatprep.subr.mxu1 %v34_v19  ;;  %1550 = vmatpush3.msra.mxu0 %v1281_v16  ;;  %v459_v8 = vld [vmem:[%s2279_s0 + $0x7a] sm:$0xff]  ;;  %v1301_v9 = vld [vmem:[%s2278_s1 + $0xd0] sm:$0xff]  ;;  %v460_v10 = vld [vmem:[%s2279_s0 + $0x82] sm:$0xff] }
  0x1a   :  { %1487 = vmatmul.mubr.msk.f32.gmra.mxu0 %vm62_vm0, %v40_v20  ;;  %1512 = vmatpush3.msra.mxu1 %v34_v19  ;;  %v1325_v11 = vld [vmem:[%s2278_s1 + $0x110] sm:$0xff]  ;;  %v26_v13 = vld [vmem:[%s2279_s0 + $0x98] sm:$0xff]  ;;  %v1300_v15 = vld [vmem:[%s2278_s1 + $0xc8] sm:$0xff] }
  0x1b   :  { %1551 = vmatprep.subr.mxu0 %v1280_v21  ;;  %1513 = vmatprep.subr.mxu1 %v33_v22  ;;  %v25_v12 = vld [vmem:[%s2279_s0 + $0x90] sm:$0xff]  ;;  %v462_v16 = vld [vmem:[%s2279_s0 + $0x9a] sm:$0xff]  ;;  %v1324_v17 = vld [vmem:[%s2278_s1 + $0x108] sm:$0xff] }
  0x1c   :  { %1552 = vmatpush3.msra.mxu0 %v1280_v21  ;;  %1501 = vmatprep.mubr.msk.f32.mxu1 %vm62_vm0, %v49_v23  ;;  %v461_v14 = vld [vmem:[%s2279_s0 + $0x92] sm:$0xff]  ;;  %v27_v18 = vld [vmem:[%s2279_s0 + $0xa8] sm:$0xff]  ;;  %v1299_v21 = vld [vmem:[%s2278_s1 + $0xc0] sm:$0xff] }
  0x1d   :  { %1514 = vmatpush3.msra.mxu1 %v33_v22  ;;  %1553 = vmatprep.subr.mxu0 %v1279_v24  ;;  %v28_v19 = vld [vmem:[%s2279_s0 + $0xb0] sm:$0xff]  ;;  %v1323_v23 = vld [vmem:[%s2278_s1 + $0x100] sm:$0xff] }
  0x1e   :  { %1489 = vmatprep.mubr.msk.f32.mxu0 %vm62_vm0, %v41_v25  ;;  %1502 = vmatmul.mubr.msk.f32.gmra.mxu1 %vm62_vm0, %v50_v26  ;;  %v463_v20 = vld [vmem:[%s2279_s0 + $0xaa] sm:$0xff]  ;;  %v464_v22 = vld [vmem:[%s2279_s0 + $0xb2] sm:$0xff] }
  0x1f   :  { %1515 = vmatprep.subr.mxu1 %v32_v27  ;;  %1554 = vmatpush3.msra.mxu0 %v1279_v24  ;;  %v683_v24 = vld [vmem:[%s2279_s0 + $0x3] sm:$0xff]  ;;  %v684_v25 = vld [vmem:[%s2279_s0 + $0xb] sm:$0xff] }
  0x20   :  { %1490 = vmatmul.mubr.msk.f32.gmra.mxu0 %vm62_vm0, %v42_v28  ;;  %1516 = vmatpush3.msra.mxu1 %v32_v27  ;;  %v917_v26 = vld [vmem:[%s2279_s0 + $0x4] sm:$0xff]  ;;  %v685_v27 = vld [vmem:[%s2279_s0 + $0x1b] sm:$0xff]  ;;  %v918_v28 = vld [vmem:[%s2279_s0 + $0xc] sm:$0xff] }
  0x21   :  { %1555 = vmatprep.subr.mxu0 %v1278_v29  ;;  %1517 = vmatprep.subr.mxu1 %v31_v30 }
  0x22   :  { %1556 = vmatpush3.msra.mxu0 %v1278_v29  ;;  %1504 = vmatprep.mubr.msk.f32.mxu1 %vm62_vm0, %v51_v31  ;;  %v919_v29 = vld [vmem:[%s2279_s0 + $0x1c] sm:$0xff]  ;;  %v687_v31 = vld [vmem:[%s2279_s0 + $0x33] sm:$0xff] }
  0x23   :  { %1518 = vmatpush3.msra.mxu1 %v31_v30  ;;  %1557 = vmatprep.subr.mxu0 %v1277_v32  ;;  %v686_v30 = vld [vmem:[%s2279_s0 + $0x23] sm:$0xff] }
  0x24   :  { %1492 = vmatprep.mubr.msk.f32.mxu0 %vm62_vm0, %v43_v33  ;;  %1505 = vmatmul.mubr.msk.f32.gmra.mxu1 %vm62_vm0, %v52_v34  ;;  %v921_v33 = vld [vmem:[%s2279_s0 + $0x34] sm:$0xff] }
  0x25   :  { %1519 = vmatprep.subr.mxu1 %v30_v35  ;;  %1558 = vmatpush3.msra.mxu0 %v1277_v32  ;;  %v920_v32 = vld [vmem:[%s2279_s0 + $0x24] sm:$0xff]  ;;  %v688_v34 = vld [vmem:[%s2279_s0 + $0x3b] sm:$0xff] }
  0x26   :  { %1493 = vmatmul.mubr.msk.f32.gmra.mxu0 %vm62_vm0, %v44_v36  ;;  %1520 = vmatpush3.msra.mxu1 %v30_v35  ;;  %v689_v35 = vld [vmem:[%s2279_s0 + $0x4b] sm:$0xff]  ;;  %v922_v36 = vld [vmem:[%s2279_s0 + $0x3c] sm:$0xff] }
  0x27   :  { %1559 = vmatprep.subr.mxu0 %v1276_v37  ;;  %1521 = vmatprep.subr.mxu1 %v29_v38 }
  0x28   :  { %1560 = vmatpush3.msra.mxu0 %v1276_v37  ;;  %1522 = vmatpush3.msra.mxu1 %v29_v38  ;;  %v923_v37 = vld [vmem:[%s2279_s0 + $0x4c] sm:$0xff] }
  0x29   :  { %1523 = vmatprep.mubr.msk.f32.mxu1 %vm62_vm0, %v13_v39  ;;  %1561 = vmatprep.subr.mxu0 %v1275_v40  ;;  %v690_v38 = vld [vmem:[%s2279_s0 + $0x53] sm:$0xff]  ;;  %v691_v39 = vld [vmem:[%s2279_s0 + $0x63] sm:$0xff] }
  0x2a   :  { %1524 = vmatmul.mubr.msk.f32.vlgmr.msra.gmra.mxu1 %vm62_vm0, %v14_v41  ;;  %1562 = vmatpush3.msra.mxu0 %v1275_v40  ;;  %v924_v40 = vld [vmem:[%s2279_s0 + $0x54] sm:$0xff]  ;;  %v925_v41 = vld [vmem:[%s2279_s0 + $0x64] sm:$0xff] }
  0x2b   :  { %1563 = vmatprep.mubr.msk.f32.mxu0 %vm62_vm0, %v449_v42  ;;  %1587 = vmatprep.subr.mxu1 %v1306_v43  ;;  %v692_v42 = vld [vmem:[%s2279_s0 + $0x6b] sm:$0xff] }
  0x2c   :  { %1564 = vmatmul.mubr.msk.f32.vlgmr.msra.gmra.mxu0 %vm62_vm0, %v450_v44  ;;  %1588 = vmatpush3.msra.mxu1 %v1306_v43  ;;  %v693_v43 = vld [vmem:[%s2279_s0 + $0x7b] sm:$0xff]  ;;  %v926_v44 = vld [vmem:[%s2279_s0 + $0x6c] sm:$0xff] }
  0x2d   :  { %1627 = vmatprep.subr.mxu0 %v1330_v45  ;;  %1526 = vmatprep.mubr.msk.f32.mxu1 %vm62_vm0, %v15_v46  ;;  %v694_v46 = vld [vmem:[%s2279_s0 + $0x83] sm:$0xff] }
  0x2e   :  { %1628 = vmatpush3.msra.mxu0 %v1330_v45  ;;  %1527 = vmatmul.mubr.msk.f32.gmra.mxu1 %vm62_vm0, %v16_v47  ;;  %v927_v45 = vld [vmem:[%s2279_s0 + $0x7c] sm:$0xff]  ;;  %v695_v47 = vld [vmem:[%s2279_s0 + $0x93] sm:$0xff] }
  0x2f   :  { %1566 = vmatprep.mubr.msk.f32.mxu0 %vm62_vm0, %v451_v48  ;;  %1589 = vmatprep.subr.mxu1 %v1305_v49  ;;  %v928_v48 = vld [vmem:[%s2279_s0 + $0x84] sm:$0xff] }
  0x30   :  { %1567 = vmatmul.mubr.msk.f32.gmra.mxu0 %vm62_vm0, %v452_v50  ;;  %1590 = vmatpush3.msra.mxu1 %v1305_v49  ;;  %v929_v49 = vld [vmem:[%s2279_s0 + $0x94] sm:$0xff] }
  0x31   :  { %1629 = vmatprep.subr.mxu0 %v1329_v51  ;;  %1529 = vmatprep.mubr.msk.f32.mxu1 %vm62_vm0, %v17_v52  ;;  %v696_v50 = vld [vmem:[%s2279_s0 + $0x9b] sm:$0xff] }
  0x32   :  { %1630 = vmatpush3.msra.mxu0 %v1329_v51  ;;  %1530 = vmatmul.mubr.msk.f32.gmra.mxu1 %vm62_vm0, %v18_v53  ;;  %v697_v51 = vld [vmem:[%s2279_s0 + $0xab] sm:$0xff]  ;;  %v930_v52 = vld [vmem:[%s2279_s0 + $0x9c] sm:$0xff] }
  0x33   :  { %1569 = vmatprep.mubr.msk.f32.mxu0 %vm62_vm0, %v453_v54  ;;  %1591 = vmatprep.subr.mxu1 %v1304_v55  ;;  %v931_v53 = vld [vmem:[%s2279_s0 + $0xac] sm:$0xff] }
  0x34   :  { %1570 = vmatmul.mubr.msk.f32.gmra.mxu0 %vm62_vm0, %v454_v56  ;;  %1592 = vmatpush3.msra.mxu1 %v1304_v55  ;;  %v698_v54 = vld [vmem:[%s2279_s0 + $0xb3] sm:$0xff] }
  0x35   :  { %1631 = vmatprep.subr.mxu0 %v1328_v57  ;;  %1532 = vmatprep.mubr.msk.f32.mxu1 %vm62_vm0, %v19_v58  ;;  %v932_v55 = vld [vmem:[%s2279_s0 + $0xb4] sm:$0xff] }
  0x36   :  { %1632 = vmatpush3.msra.mxu0 %v1328_v57  ;;  %1533 = vmatmul.mubr.msk.f32.gmra.mxu1 %vm62_vm0, %v20_v59 }
  0x37   :  { %1572 = vmatprep.mubr.msk.f32.mxu0 %vm62_vm0, %v455_v60  ;;  %1593 = vmatprep.subr.mxu1 %v1303_v61 }
  0x38   :  { %1573 = vmatmul.mubr.msk.f32.gmra.mxu0 %vm62_vm0, %v456_v62  ;;  %1594 = vmatpush3.msra.mxu1 %v1303_v61 }
  0x39   :  { %1633 = vmatprep.subr.mxu0 %v1327_v63  ;;  %1535 = vmatprep.mubr.msk.f32.mxu1 %vm62_vm0, %v21_v0 }
  0x3a   :  { %1634 = vmatpush3.msra.mxu0 %v1327_v63  ;;  %1536 = vmatmul.mubr.msk.f32.gmra.mxu1 %vm62_vm0, %v22_v1 }
  0x3b   :  { %1575 = vmatprep.mubr.msk.f32.mxu0 %vm62_vm0, %v457_v2  ;;  %1595 = vmatprep.subr.mxu1 %v1302_v3 }
  0x3c   :  { %1576 = vmatmul.mubr.msk.f32.gmra.mxu0 %vm62_vm0, %v458_v4  ;;  %1596 = vmatpush3.msra.mxu1 %v1302_v3 }
  0x3d   :  { %1635 = vmatprep.subr.mxu0 %v1326_v5  ;;  %1538 = vmatprep.mubr.msk.f32.mxu1 %vm62_vm0, %v23_v6 }
  0x3e   :  { %1636 = vmatpush3.msra.mxu0 %v1326_v5  ;;  %1539 = vmatmul.mubr.msk.f32.gmra.mxu1 %vm62_vm0, %v24_v7 }
  0x3f   :  { %1578 = vmatprep.mubr.msk.f32.mxu0 %vm62_vm0, %v459_v8  ;;  %1597 = vmatprep.subr.mxu1 %v1301_v9 }
  0x40   :  { %1579 = vmatmul.mubr.msk.f32.gmra.mxu0 %vm62_vm0, %v460_v10  ;;  %1598 = vmatpush3.msra.mxu1 %v1301_v9 }
  0x41   :  { %1637 = vmatprep.subr.mxu0 %v1325_v11  ;;  %1541 = vmatprep.mubr.msk.f32.mxu1 %vm62_vm0, %v25_v12 }
  0x42   :  { %1638 = vmatpush3.msra.mxu0 %v1325_v11  ;;  %1542 = vmatmul.mubr.msk.f32.gmra.mxu1 %vm62_vm0, %v26_v13 }
  0x43   :  { %1581 = vmatprep.mubr.msk.f32.mxu0 %vm62_vm0, %v461_v14  ;;  %1599 = vmatprep.subr.mxu1 %v1300_v15 }
  0x44   :  { %1582 = vmatmul.mubr.msk.f32.gmra.mxu0 %vm62_vm0, %v462_v16  ;;  %1600 = vmatpush3.msra.mxu1 %v1300_v15 }
  0x45   :  { %1639 = vmatprep.subr.mxu0 %v1324_v17  ;;  %1544 = vmatprep.mubr.msk.f32.mxu1 %vm62_vm0, %v27_v18 }
  0x46   :  { %1640 = vmatpush3.msra.mxu0 %v1324_v17  ;;  %1545 = vmatmul.mubr.msk.f32.gmra.mxu1 %vm62_vm0, %v28_v19 }
  0x47   :  { %1584 = vmatprep.mubr.msk.f32.mxu0 %vm62_vm0, %v463_v20  ;;  %1601 = vmatprep.subr.mxu1 %v1299_v21 }
  0x48   :  { %1585 = vmatmul.mubr.msk.f32.gmra.mxu0 %vm62_vm0, %v464_v22  ;;  %1602 = vmatpush3.msra.mxu1 %v1299_v21 }
  0x49   :  { %1641 = vmatprep.subr.mxu0 %v1323_v23  ;;  %1603 = vmatprep.mubr.msk.f32.mxu1 %vm62_vm0, %v683_v24 }
  0x4a   :  { %1642 = vmatpush3.msra.mxu0 %v1323_v23  ;;  %1604 = vmatmul.mubr.msk.f32.vlgmr.msra.gmra.mxu1 %vm62_vm0, %v684_v25 }
  0x4b   :  { %1643 = vmatprep.mubr.msk.f32.mxu0 %vm62_vm0, %v917_v26  ;;  %1606 = vmatprep.mubr.msk.f32.mxu1 %vm62_vm0, %v685_v27 }
  0x4c   :  { %1644 = vmatmul.mubr.msk.f32.vlgmr.msra.gmra.mxu0 %vm62_vm0, %v918_v28 }
  0x4d   :  { %1646 = vmatprep.mubr.msk.f32.mxu0 %vm62_vm0, %v919_v29 }
  0x4e   :  { %1607 = vmatmul.mubr.msk.f32.gmra.mxu1 %vm62_vm0, %v686_v30 }
  0x4f   :  { %1609 = vmatprep.mubr.msk.f32.mxu1 %vm62_vm0, %v687_v31 }
  0x50   :  { %1647 = vmatmul.mubr.msk.f32.gmra.mxu0 %vm62_vm0, %v920_v32 }
  0x51   :  { %1649 = vmatprep.mubr.msk.f32.mxu0 %vm62_vm0, %v921_v33 }
  0x52   :  { %1610 = vmatmul.mubr.msk.f32.gmra.mxu1 %vm62_vm0, %v688_v34 }
  0x53   :  { %1612 = vmatprep.mubr.msk.f32.mxu1 %vm62_vm0, %v689_v35 }
  0x54   :  { %1650 = vmatmul.mubr.msk.f32.gmra.mxu0 %vm62_vm0, %v922_v36 }
  0x55   :  { %1652 = vmatprep.mubr.msk.f32.mxu0 %vm62_vm0, %v923_v37 }
  0x56   :  { %1613 = vmatmul.mubr.msk.f32.gmra.mxu1 %vm62_vm0, %v690_v38 }
  0x57   :  { %1615 = vmatprep.mubr.msk.f32.mxu1 %vm62_vm0, %v691_v39 }
  0x58   :  { %1653 = vmatmul.mubr.msk.f32.gmra.mxu0 %vm62_vm0, %v924_v40 }
  0x59   :  { %1655 = vmatprep.mubr.msk.f32.mxu0 %vm62_vm0, %v925_v41 }
  0x5a   :  { %1616 = vmatmul.mubr.msk.f32.gmra.mxu1 %vm62_vm0, %v692_v42 }
  0x5b   :  { %1618 = vmatprep.mubr.msk.f32.mxu1 %vm62_vm0, %v693_v43 }
  0x5c   :  { %1656 = vmatmul.mubr.msk.f32.gmra.mxu0 %vm62_vm0, %v926_v44 }
  0x5d   :  { %1658 = vmatprep.mubr.msk.f32.mxu0 %vm62_vm0, %v927_v45 }
  0x5e   :  { %1619 = vmatmul.mubr.msk.f32.gmra.mxu1 %vm62_vm0, %v694_v46 }
  0x5f   :  { %1621 = vmatprep.mubr.msk.f32.mxu1 %vm62_vm0, %v695_v47 }
  0x60   :  { %1659 = vmatmul.mubr.msk.f32.gmra.mxu0 %vm62_vm0, %v928_v48 }
  0x61   :  { %1661 = vmatprep.mubr.msk.f32.mxu0 %vm62_vm0, %v929_v49 }
  0x62   :  { %1622 = vmatmul.mubr.msk.f32.gmra.mxu1 %vm62_vm0, %v696_v50 }
  0x63   :  { %1624 = vmatprep.mubr.msk.f32.mxu1 %vm62_vm0, %v697_v51 }
  0x64   :  { %1662 = vmatmul.mubr.msk.f32.gmra.mxu0 %vm62_vm0, %v930_v52 }
  0x65   :  { %1664 = vmatprep.mubr.msk.f32.mxu0 %vm62_vm0, %v931_v53 }
  0x66   :  { %1625 = vmatmul.mubr.msk.f32.gmra.mxu1 %vm62_vm0, %v698_v54 }
  0x68   :  { %1665 = vmatmul.mubr.msk.f32.gmra.mxu0 %vm62_vm0, %v932_v55 }
  0xd3   :  { %v2143_v56 = vpop.f32.mrf.mxu1 }
  0xd4   :  { %v1485_v57 = vpop.f32.mrf.mxu0 }
  0xd5   :  { %v2145_v58 = vpop.f32.mrf.mxu1 }
  0xd6   :  { %v177_v59 = vpop.f32.mrf.mxu0 }
  0xd8   :  { %v2147_v60 = vpop.f32.mrf.mxu1 }
  0xda   :  { %v1488_v61 = vpop.f32.mrf.mxu0  ;;  %v2149_v62 = vpop.f32.mrf.mxu1 }
  0xdc   :  { %v187_v63 = vpop.f32.mrf.mxu0 }
  0xde   :  { %v2151_v0 = vpop.f32.mrf.mxu1 }
  0xe0   :  { %v1491_v1 = vpop.f32.mrf.mxu0  ;;  %v2153_v2 = vpop.f32.mrf.mxu1 }
  0xe2   :  { %v197_v3 = vpop.f32.mrf.mxu0 }
  0xe4   :  { %v2155_v4 = vpop.f32.mrf.mxu1 }
  0xe6   :  { %v2157_v5 = vpop.f32.mrf.mxu0  ;;  %v2159_v6 = vpop.f32.mrf.mxu1 }
  0xe8   :  { %v2161_v7 = vpop.f32.mrf.mxu0 }
  0xea   :  { %v1525_v8 = vpop.f32.mrf.mxu1 }
  0xeb   :  { %v376_v35 = vadd.f32 %v1525_v8, %v1485_v57 }
  0xec   :  { %v1565_v9 = vpop.f32.mrf.mxu0  ;;  %v370_v10 = vpop.f32.mrf.mxu1 }
  0xed   :  { %v371_v38 = vadd.f32 %v370_v10, %v177_v59  ;;  %v668_v41 = vadd.f32 %v1565_v9, %v376_v35 }
  0xee   :  { %v588_v11 = vpop.f32.mrf.mxu0  ;;  %v1528_v12 = vpop.f32.mrf.mxu1 }
  0xef   :  { %v386_v42 = vadd.f32 %v1528_v12, %v1488_v61  ;;  %v667_v45 = vadd.f32 %v588_v11, %v371_v38 }
  0xf0   :  { %v1568_v13 = vpop.f32.mrf.mxu0  ;;  %v380_v14 = vpop.f32.mrf.mxu1 }
  0xf1   :  { %v381_v46 = vadd.f32 %v380_v14, %v187_v63  ;;  %v670_v50 = vadd.f32 %v1568_v13, %v386_v42 }
  0xf2   :  { %v598_v15 = vpop.f32.mrf.mxu0  ;;  %v1531_v16 = vpop.f32.mrf.mxu1 }
  0xf3   :  { %v396_v51 = vadd.f32 %v1531_v16, %v1491_v1  ;;  %v669_v57 = vadd.f32 %v598_v15, %v381_v46 }
  0xf4   :  { %v1571_v17 = vpop.f32.mrf.mxu0  ;;  %v390_v18 = vpop.f32.mrf.mxu1 }
  0xf5   :  { %v391_v59 = vadd.f32 %v390_v18, %v197_v3  ;;  %v672_v63 = vadd.f32 %v1571_v17, %v396_v51 }
  0xf6   :  { %v608_v19 = vpop.f32.mrf.mxu0  ;;  %v1534_v20 = vpop.f32.mrf.mxu1 }
  0xf7   :  { %v406_v13 = vadd.f32 %v1534_v20, %v2157_v5  ;;  %v671_v18 = vadd.f32 %v608_v19, %v391_v59 }
  0xf8   :  { %v2163_v21 = vpop.f32.mrf.mxu0  ;;  %v400_v22 = vpop.f32.mrf.mxu1 }
  0xf9   :  { %v401_v3 = vadd.f32 %v400_v22, %v2161_v7  ;;  %v674_v22 = vadd.f32 %v2163_v21, %v406_v13 }
  0xfa   :  { %v2165_v23 = vpop.f32.mrf.mxu0  ;;  %v1537_v24 = vpop.f32.mrf.mxu1 }
  0xfb   :  { %v673_v46 = vadd.f32 %v2165_v23, %v401_v3 }
  0xfc   :  { %v2167_v25 = vpop.f32.mrf.mxu0  ;;  %v2169_v26 = vpop.f32.mrf.mxu1 }
  0xfe   :  { %v2171_v27 = vpop.f32.mrf.mxu0  ;;  %v2173_v28 = vpop.f32.mrf.mxu1 }
  0xff   :  { %v426_v21 = vadd.f32 %v2173_v28, %v2147_v60 }
 0x100   :  { %v2175_v29 = vpop.f32.mrf.mxu0  ;;  %v2177_v30 = vpop.f32.mrf.mxu1 }
 0x102   :  { %v2179_v31 = vpop.f32.mrf.mxu0  ;;  %v2181_v32 = vpop.f32.mrf.mxu1 }
 0x104   :  { %v2183_v33 = vpop.f32.mrf.mxu0  ;;  %v2185_v34 = vpop.f32.mrf.mxu1 }
 0x106   :  { %v2187_v36 = vpop.f32.mrf.mxu0  ;;  %v2189_v37 = vpop.f32.mrf.mxu1 }
 0x108   :  { %v2191_v39 = vpop.f32.mrf.mxu0  ;;  %v2193_v40 = vpop.f32.mrf.mxu1 }
 0x10a   :  { %v2195_v43 = vpop.f32.mrf.mxu0  ;;  %v1605_v44 = vpop.f32.mrf.mxu1 }
 0x10b   :  { %v902_v47 = vadd.f32 %v1605_v44, %v668_v41  ;;  %v416_v41 = vadd.f32 %v1537_v24, %v2143_v56 }
 0x10c   :  { %v1645_v48 = vpop.f32.mrf.mxu0  ;;  %v822_v49 = vpop.f32.mrf.mxu1 }
 0x10d   :  { %v1136_v52 = vadd.f32 %v1645_v48, %v902_v47  ;;  %v901_v53 = vadd.f32 %v822_v49, %v667_v45  ;;  %v676_v51 = vadd.f32 %v2167_v25, %v416_v41  ;;  %v421_v25 = vadd.f32 %v2177_v30, %v2149_v62 }
 0x10e   :  { %v1056_v54 = vpop.f32.mrf.mxu0  ;;  %v1608_v55 = vpop.f32.mrf.mxu1 }
 0x10f   :  { %1152 = vst [vmem:[%s2280_s2 + $0x8] sm:$0xff] %v1136_v52  ;;  %v1135_v61 = vadd.f32 %v1056_v54, %v901_v53  ;;  %v904_v8 = vadd.f32 %v1608_v55, %v670_v50  ;;  %v1190_v14 = vmul.f32 %v1136_v52, %v1136_v52 }
 0x110   :  { %v1648_v9 = vpop.f32.mrf.mxu0  ;;  %v832_v10 = vpop.f32.mrf.mxu1 }
 0x111   :  { %1151 = vst [vmem:[%s2280_s2] sm:$0xff] %v1135_v61  ;;  %v1189_v1 = vmul.f32 %v1135_v61, %v1135_v61  ;;  %v1138_v11 = vadd.f32 %v1648_v9, %v904_v8  ;;  %v903_v12 = vadd.f32 %v832_v10, %v669_v57  ;;  %v1167_v35 = vadd.f32 %v1136_v52, %v1135_v61 }
 0x112   :  { %v1066_v15 = vpop.f32.mrf.mxu0  ;;  %v1611_v16 = vpop.f32.mrf.mxu1  ;;  %v411_v52 = vadd.f32 %v2169_v26, %v2145_v58 }
 0x113   :  { %1154 = vst [vmem:[%s2280_s2 + $0x18] sm:$0xff] %v1138_v11  ;;  %v1137_v17 = vadd.f32 %v1066_v15, %v903_v12  ;;  %v906_v38 = vadd.f32 %v1611_v16, %v672_v63  ;;  %v1205_v42 = vadd.f32 %v1190_v14, %v1189_v1  ;;  %v1192_v49 = vmul.f32 %v1138_v11, %v1138_v11 }
 0x114   :  { %v1651_v44 = vpop.f32.mrf.mxu0  ;;  %v842_v45 = vpop.f32.mrf.mxu1  ;;  %v675_v1 = vadd.f32 %v2171_v27, %v411_v52  ;;  %v436_v12 = vadd.f32 %v2181_v32, %v2151_v0  ;;  %v677_v27 = vadd.f32 %v2179_v31, %v421_v25  ;;  %v446_v31 = vadd.f32 %v2189_v37, %v2155_v4 }
 0x115   :  { %1153 = vst [vmem:[%s2280_s2 + $0x10] sm:$0xff] %v1137_v17  ;;  %v1168_v5 = vadd.f32 %v1167_v35, %v1137_v17  ;;  %v1191_v7 = vmul.f32 %v1137_v17, %v1137_v17  ;;  %v1140_v20 = vadd.f32 %v1651_v44, %v906_v38  ;;  %v905_v19 = vadd.f32 %v842_v45, %v671_v18 }
 0x116   :  { %v1076_v47 = vpop.f32.mrf.mxu0  ;;  %v1614_v48 = vpop.f32.mrf.mxu1  ;;  %v680_v41 = vadd.f32 %v2183_v33, %v436_v12  ;;  %v441_v33 = vadd.f32 %v2193_v40, %v2159_v6 }
 0x117   :  { %v1206_v50 = vadd.f32 %v1205_v42, %v1191_v7  ;;  %1156 = vst [vmem:[%s2280_s2 + $0x28] sm:$0xff] %v1140_v20  ;;  %v1139_v56 = vadd.f32 %v1076_v47, %v905_v19  ;;  %v1169_v24 = vadd.f32 %v1168_v5, %v1138_v11  ;;  %v908_v53 = vadd.f32 %v1614_v48, %v674_v22 }
 0x118   :  { %v1654_v23 = vpop.f32.mrf.mxu0  ;;  %v852_v54 = vpop.f32.mrf.mxu1  ;;  %v1194_v8 = vmul.f32 %v1140_v20, %v1140_v20  ;;  %v678_v11 = vadd.f32 %v2175_v29, %v426_v21  ;;  %v431_v29 = vadd.f32 %v2185_v34, %v2153_v2 }
 0x119   :  { %1155 = vst [vmem:[%s2280_s2 + $0x20] sm:$0xff] %v1139_v56  ;;  %v1170_v55 = vadd.f32 %v1169_v24, %v1139_v56  ;;  %v1193_v57 = vmul.f32 %v1139_v56, %v1139_v56  ;;  %v1207_v59 = vadd.f32 %v1206_v50, %v1192_v49  ;;  %v907_v61 = vadd.f32 %v852_v54, %v673_v46 }
 0x11a   :  { %v1142_v9 = vadd.f32 %v1654_v23, %v908_v53  ;;  %v1086_v58 = vpop.f32.mrf.mxu0  ;;  %v1617_v26 = vpop.f32.mrf.mxu1  ;;  %v679_v46 = vadd.f32 %v2187_v36, %v431_v29  ;;  %v682_v24 = vadd.f32 %v2191_v39, %v446_v31  ;;  %v681_v23 = vadd.f32 %v2195_v43, %v441_v33 }
 0x11b   :  { %v1208_v10 = vadd.f32 %v1207_v59, %v1193_v57  ;;  %v1141_v60 = vadd.f32 %v1086_v58, %v907_v61  ;;  %v1171_v28 = vadd.f32 %v1170_v55, %v1140_v20  ;;  %v910_v63 = vadd.f32 %v1617_v26, %v676_v51 }
 0x11c   :  { %1158 = vst [vmem:[%s2280_s2 + $0x38] sm:$0xff] %v1142_v9  ;;  %v1657_v62 = vpop.f32.mrf.mxu0  ;;  %v862_v30 = vpop.f32.mrf.mxu1  ;;  %v1196_v18 = vmul.f32 %v1142_v9, %v1142_v9 }
 0x11d   :  { %1157 = vst [vmem:[%s2280_s2 + $0x30] sm:$0xff] %v1141_v60  ;;  %v1172_v13 = vadd.f32 %v1171_v28, %v1141_v60  ;;  %v1195_v3 = vmul.f32 %v1141_v60, %v1141_v60  ;;  %v1209_v14 = vadd.f32 %v1208_v10, %v1194_v8  ;;  %v1144_v15 = vadd.f32 %v1657_v62, %v910_v63 }
 0x11e   :  { %v909_v0 = vadd.f32 %v862_v30, %v675_v1  ;;  %v1096_v32 = vpop.f32.mrf.mxu0  ;;  %v1620_v16 = vpop.f32.mrf.mxu1 }
 0x11f   :  { %v1210_v35 = vadd.f32 %v1209_v14, %v1195_v3  ;;  %1160 = vst [vmem:[%s2280_s2 + $0x48] sm:$0xff] %v1144_v15  ;;  %v1173_v17 = vadd.f32 %v1172_v13, %v1142_v9  ;;  %v912_v38 = vadd.f32 %v1620_v16, %v678_v11  ;;  %v1198_v47 = vmul.f32 %v1144_v15, %v1144_v15 }
 0x120   :  { %v1143_v42 = vadd.f32 %v1096_v32, %v909_v0  ;;  %v1660_v44 = vpop.f32.mrf.mxu0  ;;  %v872_v45 = vpop.f32.mrf.mxu1 }
 0x121   :  { %v1211_v2 = vadd.f32 %v1210_v35, %v1196_v18  ;;  %v1146_v34 = vadd.f32 %v1660_v44, %v912_v38  ;;  %v911_v5 = vadd.f32 %v872_v45, %v677_v27 }
 0x122   :  { %1159 = vst [vmem:[%s2280_s2 + $0x40] sm:$0xff] %v1143_v42  ;;  %v1174_v7 = vadd.f32 %v1173_v17, %v1143_v42  ;;  %v1197_v20 = vmul.f32 %v1143_v42, %v1143_v42  ;;  %v1106_v19 = vpop.f32.mrf.mxu0  ;;  %v1623_v22 = vpop.f32.mrf.mxu1 }
 0x123   :  { %1162 = vst [vmem:[%s2280_s2 + $0x58] sm:$0xff] %v1146_v34  ;;  %v1145_v4 = vadd.f32 %v1106_v19, %v911_v5  ;;  %v914_v37 = vadd.f32 %v1623_v22, %v680_v41  ;;  %v1200_v39 = vmul.f32 %v1146_v34, %v1146_v34 }
 0x124   :  { %v1212_v48 = vadd.f32 %v1211_v2, %v1197_v20  ;;  %v1175_v49 = vadd.f32 %v1174_v7, %v1144_v15  ;;  %v1663_v50 = vpop.f32.mrf.mxu0  ;;  %v882_v56 = vpop.f32.mrf.mxu1 }
 0x125   :  { %1161 = vst [vmem:[%s2280_s2 + $0x50] sm:$0xff] %v1145_v4  ;;  %v1199_v36 = vmul.f32 %v1145_v4, %v1145_v4  ;;  %v1148_v51 = vadd.f32 %v1663_v50, %v914_v37  ;;  %v913_v6 = vadd.f32 %v882_v56, %v679_v46 }
 0x126   :  { %v1176_v40 = vadd.f32 %v1175_v49, %v1145_v4  ;;  %v1213_v52 = vadd.f32 %v1212_v48, %v1198_v47  ;;  %v1116_v21 = vpop.f32.mrf.mxu0  ;;  %v1626_v53 = vpop.f32.mrf.mxu1 }
 0x127   :  { %1164 = vst [vmem:[%s2280_s2 + $0x68] sm:$0xff] %v1148_v51  ;;  %v1147_v54 = vadd.f32 %v1116_v21, %v913_v6  ;;  %v916_v55 = vadd.f32 %v1626_v53, %v682_v24  ;;  %v1202_v28 = vmul.f32 %v1148_v51, %v1148_v51 }
 0x128   :  { %v1214_v57 = vadd.f32 %v1213_v52, %v1199_v36  ;;  %v1177_v59 = vadd.f32 %v1176_v40, %v1146_v34  ;;  %v1666_v61 = vpop.f32.mrf.mxu0  ;;  %v892_v25 = vpop.f32.mrf.mxu1 }
 0x129   :  { %1163 = vst [vmem:[%s2280_s2 + $0x60] sm:$0xff] %v1147_v54  ;;  %v1201_v8 = vmul.f32 %v1147_v54, %v1147_v54  ;;  %v1150_v9 = vadd.f32 %v1666_v61, %v916_v55  ;;  %v915_v58 = vadd.f32 %v892_v25, %v681_v23 }
 0x12a   :  { %v1178_v26 = vadd.f32 %v1177_v59, %v1147_v54  ;;  %v1215_v43 = vadd.f32 %v1214_v57, %v1200_v39  ;;  %v1126_v10 = vpop.f32.mrf.mxu0 }
 0x12b   :  { %1166 = vst [vmem:[%s2280_s2 + $0x78] sm:$0xff] %v1150_v9  ;;  %v1149_v60 = vadd.f32 %v1126_v10, %v915_v58  ;;  %v1204_v30 = vmul.f32 %v1150_v9, %v1150_v9 }
 0x12c   :  { %v1216_v63 = vadd.f32 %v1215_v43, %v1201_v8  ;;  %v1179_v1 = vadd.f32 %v1178_v26, %v1148_v51 }
 0x12d   :  { %1165 = vst [vmem:[%s2280_s2 + $0x70] sm:$0xff] %v1149_v60  ;;  %v1203_v11 = vmul.f32 %v1149_v60, %v1149_v60 }
 0x12e   :  { %v1180_v12 = vadd.f32 %v1179_v1, %v1149_v60  ;;  %v1217_v62 = vadd.f32 %v1216_v63, %v1202_v28 }
 0x130   :  { %v1181_v13 = vadd.f32 %v1180_v12, %v1150_v9  ;;  %v1218_v3 = vadd.f32 %v1217_v62, %v1203_v11 }
 0x132   :  { %v1182_v14 = vrot.slane %v1181_v13, 4  ;;  %v1219_v15 = vadd.f32 %v1218_v3, %v1204_v30 }
 0x134   :  { %v1183_v27 = vadd.f32 %v1182_v14, %v1181_v13  ;;  %v1220_v29 = vrot.slane %v1219_v15, 4 }
 0x136   :  { %v1184_v0 = vrot.slane %v1183_v27, 2  ;;  %v1221_v32 = vadd.f32 %v1220_v29, %v1219_v15 }
 0x138   :  { %v1185_v16 = vadd.f32 %v1184_v0, %v1183_v27  ;;  %v1222_v18 = vrot.slane %v1221_v32, 2 }
 0x13a   :  { %v1186_v35 = vrot.slane %v1185_v16, 1  ;;  %v1223_v17 = vadd.f32 %v1222_v18, %v1221_v32 }
 0x13c   :  { %v1187_v38 = vadd.f32 %v1186_v35, %v1185_v16  ;;  %v1224_v41 = vrot.slane %v1223_v17, 1 }
 0x13e   :  { %1188 = vst [vmem:[%s2281_s3] sm:$0x1] %v1187_v38  ;;  %v1225_v42 = vadd.f32 %v1224_v41, %v1223_v17 }
 0x140   :  { %1226 = vst [vmem:[%s2281_s3 + $0x1] sm:$0x1] %v1225_v42 }

// kernel: sew_rdb_forward.3
= control target key start
LH: loop header
LB: loop body
LE: loop exit
PB: predicated region body
PF: predicated region fallthrough
CT: control target
= control target key end

     0   :  { %v1902_v3 = vmov 0.0   ;;  %s2675_s3 = inlined_call_operand.vmem [shape: f32[5,128,128], index: 3, kind: input, shape index: {}]   ;;  %s2676_s1 = inlined_call_operand.vmem [shape: f32[4,128], index: 1, kind: input, shape index: {}]   ;;  %s2677_s0 = inlined_call_operand.vmem [shape: f32[4,2,16,128], index: 0, kind: input, shape index: {}]   ;;  %s2678_s2 = inlined_call_operand.vmem [shape: f32[4,128], index: 2, kind: input, shape index: {}]   ;;  %s2679_s6 = inlined_call_operand.vmem [shape: f32[1,1,128], index: 6, kind: output, shape index: {2}]   ;;  %s2680_s4 = inlined_call_operand.vmem [shape: f32[4,2,16,128], index: 4, kind: output, shape index: {0}]   ;;  %s2681_s5 = inlined_call_operand.vmem [shape: f32[1,2,128], index: 5, kind: output, shape index: {1}]  }
   0x1   :  { %v1364_v0 = vld [vmem:[%s2675_s3 + $0xf8] sm:$0xff]  ;;  %v1363_v2 = vld [vmem:[%s2675_s3 + $0xf0] sm:$0xff]  ;;  %20 = vst [vmem:[#allocation2] sm:$0x3] %v1902_v3  ;;  %21 = vst [vmem:[#allocation2 + $0x18] sm:$0x3] %v1902_v3 }
   0x2   :  { %v319_v1 = vld [vmem:[%s2675_s3 + $0x78] sm:$0xff]  ;;  %22 = vst [vmem:[#allocation2 + $0x30] sm:$0x3] %v1902_v3  ;;  %23 = vst [vmem:[#allocation2 + $0x48] sm:$0x3] %v1902_v3  ;;  %1573 = vmatprep.subr.mxu0 %v1364_v0  ;;  %v318_v4 = vld [vmem:[%s2675_s3 + $0x70] sm:$0xff] }
   0x3   :  { %24 = vst [vmem:[#allocation2 + $0x60] sm:$0x3] %v1902_v3  ;;  %25 = vst [vmem:[#allocation2 + $0x78] sm:$0x3] %v1902_v3  ;;  %1629 = vmatprep.subr.mxu1 %v319_v1  ;;  %1574 = vmatpush3.msra.mxu0 %v1364_v0  ;;  %v1362_v5 = vld [vmem:[%s2675_s3 + $0xe8] sm:$0xff]  ;;  %v1361_v7 = vld [vmem:[%s2675_s3 + $0xe0] sm:$0xff] }
   0x4   :  { %26 = vst [vmem:[#allocation2 + $0x90] sm:$0x3] %v1902_v3  ;;  %27 = vst [vmem:[#allocation2 + $0xa8] sm:$0x3] %v1902_v3  ;;  %1630 = vmatpush3.msra.mxu1 %v319_v1  ;;  %v317_v6 = vld [vmem:[%s2675_s3 + $0x68] sm:$0xff]  ;;  %1575 = vmatprep.subr.mxu0 %v1363_v2  ;;  %v316_v8 = vld [vmem:[%s2675_s3 + $0x60] sm:$0xff] }
   0x5   :  { %28 = vst [vmem:[#allocation2 + $0x12] sm:$0x3] %v1902_v3  ;;  %29 = vst [vmem:[#allocation2 + $0x2a] sm:$0x3] %v1902_v3  ;;  %1631 = vmatprep.subr.mxu1 %v318_v4  ;;  %1576 = vmatpush3.msra.mxu0 %v1363_v2  ;;  %v1360_v9 = vld [vmem:[%s2675_s3 + $0xd8] sm:$0xff]  ;;  %v1359_v11 = vld [vmem:[%s2675_s3 + $0xd0] sm:$0xff] }
   0x6   :  { %30 = vst [vmem:[#allocation2 + $0x42] sm:$0x3] %v1902_v3  ;;  %31 = vst [vmem:[#allocation2 + $0x5a] sm:$0x3] %v1902_v3  ;;  %1632 = vmatpush3.msra.mxu1 %v318_v4  ;;  %1577 = vmatprep.subr.mxu0 %v1362_v5  ;;  %v315_v10 = vld [vmem:[%s2675_s3 + $0x58] sm:$0xff]  ;;  %v314_v12 = vld [vmem:[%s2675_s3 + $0x50] sm:$0xff] }
   0x7   :  { %32 = vst [vmem:[#allocation2 + $0x72] sm:$0x3] %v1902_v3  ;;  %33 = vst [vmem:[#allocation2 + $0x8a] sm:$0x3] %v1902_v3  ;;  %1633 = vmatprep.subr.mxu1 %v317_v6  ;;  %1578 = vmatpush3.msra.mxu0 %v1362_v5  ;;  %v1358_v13 = vld [vmem:[%s2675_s3 + $0xc8] sm:$0xff]  ;;  %v1357_v15 = vld [vmem:[%s2675_s3 + $0xc0] sm:$0xff] }
   0x8   :  { %34 = vst [vmem:[#allocation2 + $0xa2] sm:$0x3] %v1902_v3  ;;  %35 = vst [vmem:[#allocation2 + $0xba] sm:$0x3] %v1902_v3  ;;  %1634 = vmatpush3.msra.mxu1 %v317_v6  ;;  %1579 = vmatprep.subr.mxu0 %v1361_v7  ;;  %v313_v14 = vld [vmem:[%s2675_s3 + $0x48] sm:$0xff]  ;;  %v312_v17 = vld [vmem:[%s2675_s3 + $0x40] sm:$0xff] }
   0x9   :  { %1635 = vmatprep.subr.mxu1 %v316_v8  ;;  %1580 = vmatpush3.msra.mxu0 %v1361_v7  ;;  %v1313_v16 = vld [vmem:[%s2676_s1] ss:$0 sm:$0xff]  ;;  %v1323_v21 = vld [vmem:[%s2676_s1 + $0x1] ss:$0 sm:$0xff]  ;;  %v39_v23 = vld [vmem:[%s2677_s0 + $0x8] sm:$0xff] }
   0xa   :  { %1636 = vmatpush3.msra.mxu1 %v316_v8  ;;  %1581 = vmatprep.subr.mxu0 %v1360_v9  ;;  %v1314_v18 = vld [vmem:[%s2678_s2] ss:$0 sm:$0xff]  ;;  %v1356_v24 = vld [vmem:[%s2675_s3 + $0xb8] sm:$0xff]  ;;  %v47_v25 = vmul.f32 %v1313_v16, %v39_v23  ;;  %v40_v28 = vld [vmem:[%s2677_s0 + $0x10] sm:$0xff] }
   0xb   :  { %1637 = vmatprep.subr.mxu1 %v315_v10  ;;  %1582 = vmatpush3.msra.mxu0 %v1360_v9  ;;  %v38_v19 = vld [vmem:[%s2677_s0] sm:$0xff]  ;;  %v311_v26 = vld [vmem:[%s2675_s3 + $0x38] sm:$0xff]  ;;  %v1355_v30 = vld [vmem:[%s2675_s3 + $0xb0] sm:$0xff]  ;;  %v48_v33 = vmul.f32 %v1313_v16, %v40_v28 }
   0xc   :  { %1638 = vmatpush3.msra.mxu1 %v315_v10  ;;  %1583 = vmatprep.subr.mxu0 %v1359_v11  ;;  %v46_v20 = vmul.f32 %v1313_v16, %v38_v19  ;;  %v1319_v22 = vld [vmem:[%s2677_s0 + $0x20] sm:$0xff]  ;;  %v41_v29 = vld [vmem:[%s2677_s0 + $0x18] sm:$0xff]  ;;  %v55_v32 = vadd.f32 %v1314_v18, %v47_v25  ;;  %v310_v34 = vld [vmem:[%s2675_s3 + $0x30] sm:$0xff] }
   0xd   :  { %1639 = vmatprep.subr.mxu1 %v314_v12  ;;  %1584 = vmatpush3.msra.mxu0 %v1359_v11  ;;  %v105_v31 = vmul.f32 %v1323_v21, %v1319_v22  ;;  %v1324_v36 = vld [vmem:[%s2678_s2 + $0x1] ss:$0 sm:$0xff]  ;;  %v49_v37 = vmul.f32 %v1313_v16, %v41_v29  ;;  %v1320_v38 = vld [vmem:[%s2677_s0 + $0x28] sm:$0xff]  ;;  %v56_v41 = vadd.f32 %v1314_v18, %v48_v33  ;;  %v1321_v45 = vld [vmem:[%s2677_s0 + $0x30] sm:$0xff] }
   0xe   :  { %1640 = vmatpush3.msra.mxu1 %v314_v12  ;;  %1585 = vmatprep.subr.mxu0 %v1358_v13  ;;  %v54_v27 = vadd.f32 %v1314_v18, %v46_v20  ;;  %v1354_v39 = vld [vmem:[%s2675_s3 + $0xa8] sm:$0xff]  ;;  %v2050_v40 = vmul.f32 0.5, %v55_v32  ;;  %v106_v42 = vmul.f32 %v1323_v21, %v1320_v38  ;;  %v1322_v46 = vld [vmem:[%s2677_s0 + $0x38] sm:$0xff]  ;;  %v1353_v50 = vld [vmem:[%s2675_s3 + $0xa0] sm:$0xff]  ;;  %v107_v55 = vmul.f32 %v1323_v21, %v1321_v45 }
   0xf   :  { %1641 = vmatprep.subr.mxu1 %v313_v14  ;;  %1586 = vmatpush3.msra.mxu0 %v1358_v13  ;;  %v309_v43 = vld [vmem:[%s2675_s3 + $0x28] sm:$0xff]  ;;  %v57_v44 = vadd.f32 %v1314_v18, %v49_v37  ;;  %v113_v48 = vadd.f32 %v1324_v36, %v105_v31  ;;  %v2068_v49 = vmul.f32 0.5, %v56_v41  ;;  %v308_v51 = vld [vmem:[%s2675_s3 + $0x20] sm:$0xff]  ;;  %v108_v58 = vmul.f32 %v1323_v21, %v1322_v46  ;;  %v1352_v59 = vld [vmem:[%s2675_s3 + $0x98] sm:$0xff] }
  0x10   :  { %1642 = vmatpush3.msra.mxu1 %v313_v14  ;;  %1587 = vmatprep.subr.mxu0 %v1357_v15  ;;  %v2039_v35 = vmul.f32 0.5, %v54_v27  ;;  %vm67_vm1 = vcmp.ge.f32.partialorder %v2050_v40, 1.0  ;;  %v114_v57 = vadd.f32 %v1324_v36, %v106_v42  ;;  %v307_v60 = vld [vmem:[%s2675_s3 + $0x18] sm:$0xff]  ;;  %v115_v2 = vadd.f32 %v1324_v36, %v107_v55  ;;  %v2112_v4 = vld [vmem:[%s2676_s1 + $0x2] ss:$0 sm:$0xff]  ;;  %v1351_v6 = vld [vmem:[%s2675_s3 + $0x90] sm:$0xff] }
  0x11   :  { %1643 = vmatprep.subr.mxu1 %v312_v17  ;;  %1588 = vmatpush3.msra.mxu0 %v1357_v15  ;;  %v2081_v53 = vsel %vm67_vm1, 1.0, %v1902_v3  ;;  %v2083_v54 = vmul.f32 0.5, %v57_v44  ;;  %vm68_vm2 = vcmp.ge.f32.partialorder %v2068_v49, 1.0  ;;  %v1329_v5 = vld [vmem:[%s2677_s0 + $0x40] sm:$0xff]  ;;  %v306_v7 = vld [vmem:[%s2675_s3 + $0x10] sm:$0xff]  ;;  %v116_v10 = vadd.f32 %v1324_v36, %v108_v58  ;;  %v1350_v13 = vld [vmem:[%s2675_s3 + $0x88] sm:$0xff] }
  0x12   :  { %1644 = vmatpush3.msra.mxu1 %v312_v17  ;;  %1589 = vmatprep.subr.mxu0 %v1356_v24  ;;  %vm66_vm0 = vcmp.ge.f32.partialorder %v2039_v35, 1.0  ;;  %v79_v56 = vsub.f32 1.0, %v2081_v53  ;;  %87 = vst [vmem:[#allocation2 + $0xa] sm:$0xff] %v2081_v53  ;;  %v2098_v62 = vsel %vm68_vm2, 1.0, %v1902_v3  ;;  %v305_v14 = vld [vmem:[%s2675_s3 + $0x8] sm:$0xff]  ;;  %v169_v17 = vmul.f32 %v2112_v4, %v1329_v5  ;;  %v1349_v22 = vld [vmem:[%s2675_s3 + $0x80] sm:$0xff] }
  0x13   :  { %1645 = vmatprep.subr.mxu1 %v311_v26  ;;  %1590 = vmatpush3.msra.mxu0 %v1356_v24  ;;  %v2065_v47 = vsel %vm66_vm0, 1.0, %v1902_v3  ;;  %vm69_vm3 = vcmp.ge.f32.partialorder %v2083_v54, 1.0  ;;  %v80_v0 = vsub.f32 1.0, %v2098_v62  ;;  %88 = vst [vmem:[#allocation2 + $0x1a] sm:$0xff] %v2098_v62  ;;  %v1330_v18 = vld [vmem:[%s2677_s0 + $0x48] sm:$0xff]  ;;  %v304_v23 = vld [vmem:[%s2675_s3] sm:$0xff] }
  0x14   :  { %1646 = vmatpush3.msra.mxu1 %v311_v26  ;;  %1591 = vmatprep.subr.mxu0 %v1355_v30  ;;  %v78_v52 = vsub.f32 1.0, %v2065_v47  ;;  %86 = vst [vmem:[#allocation2 + $0x2] sm:$0xff] %v2065_v47  ;;  %v83_v63 = vmul.f32 %v79_v56, %v2050_v40  ;;  %v2107_v1 = vsel %vm69_vm3, 1.0, %v1902_v3  ;;  %v2140_v21 = vld [vmem:[%s2678_s2 + $0x2] ss:$0 sm:$0xff]  ;;  %v1331_v26 = vld [vmem:[%s2677_s0 + $0x50] sm:$0xff] }
  0x15   :  { %1647 = vmatprep.subr.mxu1 %v310_v34  ;;  %1592 = vmatpush3.msra.mxu0 %v1355_v30  ;;  %v81_v9 = vsub.f32 1.0, %v2107_v1  ;;  %89 = vst [vmem:[#allocation2 + $0x22] sm:$0xff] %v2107_v1  ;;  %v84_v11 = vmul.f32 %v80_v0, %v2068_v49  ;;  %v170_v30 = vmul.f32 %v2112_v4, %v1330_v18  ;;  %v1332_v31 = vld [vmem:[%s2677_s0 + $0x58] sm:$0xff]  ;;  %v1395_v55 = vld [vmem:[%s2675_s3 + $0x1f0] sm:$0xff]  ;;  %v2206_v58 = vld [vmem:[%s2676_s1 + $0x3] ss:$0 sm:$0xff] }
  0x16   :  { %1648 = vmatpush3.msra.mxu1 %v310_v34  ;;  %1593 = vmatprep.subr.mxu0 %v1354_v39  ;;  %v82_v61 = vmul.f32 %v78_v52, %v2039_v35  ;;  %v118_v12 = vsub.f32 %v114_v57, %v83_v63  ;;  %v177_v34 = vadd.f32 %v2140_v21, %v169_v17  ;;  %v1380_v42 = vld [vmem:[%s2675_s3 + $0x178] sm:$0xff]  ;;  %v1379_v52 = vld [vmem:[%s2675_s3 + $0x170] sm:$0xff]  ;;  %v1340_v17 = vld [vmem:[%s2677_s0 + $0x68] sm:$0xff] }
  0x17   :  { %1649 = vmatprep.subr.mxu1 %v309_v43  ;;  %1594 = vmatpush3.msra.mxu0 %v1354_v39  ;;  %v85_v16 = vmul.f32 %v81_v9, %v2083_v54  ;;  %v119_v20 = vsub.f32 %v115_v2, %v84_v11  ;;  %v171_v41 = vmul.f32 %v2112_v4, %v1331_v26  ;;  %v1341_v26 = vld [vmem:[%s2677_s0 + $0x70] sm:$0xff]  ;;  %v1410_v40 = vld [vmem:[%s2675_s3 + $0x268] sm:$0xff]  ;;  %v1408_v54 = vld [vmem:[%s2675_s3 + $0x258] sm:$0xff] }
  0x18   :  { %1650 = vmatpush3.msra.mxu1 %v309_v43  ;;  %1595 = vmatprep.subr.mxu0 %v1353_v50  ;;  %v117_v8 = vsub.f32 %v113_v48, %v82_v61  ;;  %v122_v19 = vmul.f32 0.5, %v118_v12  ;;  %v1396_v43 = vld [vmem:[%s2675_s3 + $0x1f8] sm:$0xff]  ;;  %v172_v48 = vmul.f32 %v2112_v4, %v1332_v31  ;;  %v1339_v4 = vld [vmem:[%s2677_s0 + $0x60] sm:$0xff]  ;;  %v1378_v12 = vld [vmem:[%s2675_s3 + $0x168] sm:$0xff] }
  0x19   :  { %1651 = vmatprep.subr.mxu1 %v308_v51  ;;  %1596 = vmatpush3.msra.mxu0 %v1353_v50  ;;  %v120_v25 = vsub.f32 %v116_v10, %v85_v16  ;;  %v123_v29 = vmul.f32 0.5, %v119_v20  ;;  %v179_v2 = vadd.f32 %v2140_v21, %v171_v41  ;;  %v2238_v20 = vld [vmem:[%s2678_s2 + $0x3] ss:$0 sm:$0xff] }
  0x1a   :  { %1652 = vmatpush3.msra.mxu1 %v308_v51  ;;  %1597 = vmatprep.subr.mxu0 %v1352_v59  ;;  %v121_v15 = vmul.f32 0.5, %v117_v8  ;;  %v2153_v28 = vadd.f32 %v122_v19, %v83_v63  ;;  %v178_v51 = vadd.f32 %v2140_v21, %v170_v30 }
  0x1b   :  { %1653 = vmatprep.subr.mxu1 %v307_v60  ;;  %1598 = vmatpush3.msra.mxu0 %v1352_v59  ;;  %v320_v27 = vld [vmem:[#allocation2 + $0x1] sm:$0xff]  ;;  %v124_v33 = vmul.f32 0.5, %v120_v25  ;;  %v321_v36 = vld [vmem:[#allocation2 + $0x9] sm:$0xff]  ;;  %v2167_v39 = vadd.f32 %v123_v29, %v84_v11  ;;  %v322_v59 = vld [vmem:[#allocation2 + $0x19] sm:$0xff] }
  0x1c   :  { %1654 = vmatpush3.msra.mxu1 %v307_v60  ;;  %1599 = vmatprep.subr.mxu0 %v1351_v6  ;;  %v2148_v24 = vadd.f32 %v121_v15, %v82_v61  ;;  %v288_v32 = vld [vmem:[#allocation2] sm:$0xff]  ;;  %v289_v37 = vld [vmem:[#allocation2 + $0x8] sm:$0xff]  ;;  %vm130_vm5 = vcmp.ge.f32.partialorder %v2153_v28, 1.0  ;;  %v290_v60 = vld [vmem:[#allocation2 + $0x18] sm:$0xff] }
  0x1d   :  { %1655 = vmatprep.subr.mxu1 %v306_v7  ;;  %1600 = vmatpush3.msra.mxu0 %v1351_v6  ;;  %v2181_v45 = vsel %vm130_vm5, 1.0, %v1902_v3  ;;  %v2183_v46 = vadd.f32 %v124_v33, %v85_v16  ;;  %vm131_vm6 = vcmp.ge.f32.partialorder %v2167_v39, 1.0  ;;  %v323_v8 = vld [vmem:[#allocation2 + $0x21] sm:$0xff]  ;;  %v233_v16 = vmul.f32 %v2206_v58, %v1339_v4  ;;  %v1342_v33 = vld [vmem:[%s2677_s0 + $0x78] sm:$0xff] }
  0x1e   :  { %1656 = vmatpush3.msra.mxu1 %v306_v7  ;;  %1601 = vmatprep.subr.mxu0 %v1350_v13  ;;  %vm129_vm4 = vcmp.ge.f32.partialorder %v2148_v24, 1.0  ;;  %v142_v50 = vsub.f32 1.0, %v2181_v45  ;;  %151 = vst [vmem:[#allocation2 + $0x3a] sm:$0xff] %v2181_v45  ;;  %v2200_v57 = vsel %vm131_vm6, 1.0, %v1902_v3  ;;  %v180_v7 = vadd.f32 %v2140_v21, %v172_v48  ;;  %v291_v9 = vld [vmem:[#allocation2 + $0x20] sm:$0xff]  ;;  %v1376_v48 = vld [vmem:[%s2675_s3 + $0x158] sm:$0xff] }
  0x1f   :  { %1657 = vmatprep.subr.mxu1 %v305_v14  ;;  %1602 = vmatpush3.msra.mxu0 %v1350_v13  ;;  %v2164_v38 = vsel %vm129_vm4, 1.0, %v1902_v3  ;;  %vm132_vm7 = vcmp.ge.f32.partialorder %v2183_v46, 1.0  ;;  %v143_v63 = vsub.f32 1.0, %v2200_v57  ;;  %152 = vst [vmem:[#allocation2 + $0x4a] sm:$0xff] %v2200_v57  ;;  %v1394_v13 = vld [vmem:[%s2675_s3 + $0x1e8] sm:$0xff]  ;;  %v1377_v21 = vld [vmem:[%s2675_s3 + $0x160] sm:$0xff] }
  0x20   :  { %1658 = vmatpush3.msra.mxu1 %v305_v14  ;;  %1603 = vmatprep.subr.mxu0 %v1349_v22  ;;  %v141_v44 = vsub.f32 1.0, %v2164_v38  ;;  %150 = vst [vmem:[#allocation2 + $0x32] sm:$0xff] %v2164_v38  ;;  %v146_v61 = vmul.f32 %v142_v50, %v2153_v28  ;;  %v2214_v0 = vsel %vm132_vm7, 1.0, %v1902_v3  ;;  %v1392_v50 = vld [vmem:[%s2675_s3 + $0x1d8] sm:$0xff]  ;;  %v840_v35 = vld [vmem:[#allocation2 + $0x23] sm:$0xff] }
  0x21   :  { %1659 = vmatprep.subr.mxu1 %v304_v23  ;;  %1604 = vmatpush3.msra.mxu0 %v1349_v22  ;;  %v144_v5 = vsub.f32 1.0, %v2214_v0  ;;  %153 = vst [vmem:[#allocation2 + $0x52] sm:$0xff] %v2214_v0  ;;  %v147_v10 = vmul.f32 %v143_v63, %v2167_v39  ;;  %v1393_v22 = vld [vmem:[%s2675_s3 + $0x1e0] sm:$0xff]  ;;  %v1391_v63 = vld [vmem:[%s2675_s3 + $0x1d0] sm:$0xff]  ;;  %v1406_v28 = vld [vmem:[%s2675_s3 + $0x248] sm:$0xff] }
  0x22   :  { %1605 = vmatprep.mubr.f32.mxu0 %v320_v27  ;;  %1660 = vmatpush3.msra.mxu1 %v304_v23  ;;  %v145_v56 = vmul.f32 %v141_v44, %v2148_v24  ;;  %v182_v11 = vsub.f32 %v178_v51, %v146_v61  ;;  %v235_v44 = vmul.f32 %v2206_v58, %v1341_v26  ;;  %v1389_v26 = vld [vmem:[%s2675_s3 + $0x1c0] sm:$0xff] }
  0x23   :  { %1661 = vmatprep.mubr.f32.mxu1 %v288_v32  ;;  %1606 = vmatmul.mubr.f32.vlgmr.msra.gmra.mxu0 %v321_v36  ;;  %v148_v14 = vmul.f32 %v144_v5, %v2183_v46  ;;  %v183_v19 = vsub.f32 %v179_v2, %v147_v10  ;;  %v234_v32 = vmul.f32 %v2206_v58, %v1340_v17  ;;  %v1404_v46 = vld [vmem:[%s2675_s3 + $0x238] sm:$0xff] }
  0x24   :  { %1662 = vmatmul.mubr.f32.vlgmr.msra.gmra.mxu1 %v289_v37  ;;  %1685 = vmatprep.subr.mxu0 %v1380_v42  ;;  %v181_v6 = vsub.f32 %v177_v34, %v145_v56  ;;  %v186_v18 = vmul.f32 0.5, %v182_v11  ;;  %v241_v36 = vadd.f32 %v2238_v20, %v233_v16 }
  0x25   :  { %1741 = vmatprep.subr.mxu1 %v1396_v43  ;;  %1686 = vmatpush3.msra.mxu0 %v1380_v42  ;;  %v184_v25 = vsub.f32 %v180_v7, %v148_v14  ;;  %v187_v31 = vmul.f32 0.5, %v183_v19 }
  0x26   :  { %1742 = vmatpush3.msra.mxu1 %v1396_v43  ;;  %1687 = vmatprep.subr.mxu0 %v1379_v52  ;;  %v185_v15 = vmul.f32 0.5, %v181_v6  ;;  %v2251_v30 = vadd.f32 %v186_v18, %v146_v61  ;;  %v1375_v61 = vld [vmem:[%s2675_s3 + $0x150] sm:$0xff]  ;;  %v294_v5 = vld [vmem:[#allocation2 + $0x48] sm:$0xff] }
  0x27   :  { %1743 = vmatprep.subr.mxu1 %v1395_v55  ;;  %1608 = vmatprep.mubr.f32.mxu0 %v322_v59  ;;  %v324_v27 = vld [vmem:[#allocation2 + $0x31] sm:$0xff]  ;;  %v188_v34 = vmul.f32 0.5, %v184_v25  ;;  %v325_v37 = vld [vmem:[#allocation2 + $0x39] sm:$0xff]  ;;  %v2265_v43 = vadd.f32 %v187_v31, %v147_v10  ;;  %v326_v4 = vld [vmem:[#allocation2 + $0x49] sm:$0xff]  ;;  %v154_v10 = vadd.f32 %v2164_v38, %v2065_v47 }
  0x28   :  { %1664 = vmatprep.mubr.f32.mxu1 %v290_v60  ;;  %1688 = vmatpush3.msra.mxu0 %v1379_v52  ;;  %v2246_v23 = vadd.f32 %v185_v15, %v145_v56  ;;  %v292_v29 = vld [vmem:[#allocation2 + $0x30] sm:$0xff]  ;;  %v293_v41 = vld [vmem:[#allocation2 + $0x38] sm:$0xff]  ;;  %vm194_vm9 = vcmp.ge.f32.partialorder %v2251_v30, 1.0  ;;  %v236_v56 = vmul.f32 %v2206_v58, %v1342_v33  ;;  %v242_v60 = vadd.f32 %v2238_v20, %v234_v32  ;;  %v1374_v47 = vld [vmem:[%s2675_s3 + $0x148] sm:$0xff] }
  0x29   :  { %1744 = vmatpush3.msra.mxu1 %v1395_v55  ;;  %1609 = vmatmul.mubr.f32.gmra.mxu0 %v323_v8  ;;  %v1336_v52 = vsel %vm194_vm9, 1.0, %v1902_v3  ;;  %v2279_v55 = vadd.f32 %v188_v34, %v148_v14  ;;  %vm195_vm10 = vcmp.ge.f32.partialorder %v2265_v43, 1.0  ;;  %v155_v14 = vadd.f32 %v2181_v45, %v2081_v53  ;;  %v327_v15 = vld [vmem:[#allocation2 + $0x51] sm:$0xff]  ;;  %v1390_v38 = vld [vmem:[%s2675_s3 + $0x1c8] sm:$0xff]  ;;  %v1373_v25 = vld [vmem:[%s2675_s3 + $0x140] sm:$0xff] }
  0x2a   :  { %1665 = vmatmul.mubr.f32.gmra.mxu1 %v291_v9  ;;  %1689 = vmatprep.subr.mxu0 %v1378_v12  ;;  %vm193_vm8 = vcmp.ge.f32.partialorder %v2246_v23, 1.0  ;;  %v206_v59 = vsub.f32 1.0, %v1336_v52  ;;  %215 = vst [vmem:[#allocation2 + $0x6a] sm:$0xff] %v1336_v52  ;;  %v1337_v58 = vsel %vm195_vm10, 1.0, %v1902_v3  ;;  %v243_v9 = vadd.f32 %v2238_v20, %v235_v44  ;;  %v295_v16 = vld [vmem:[#allocation2 + $0x50] sm:$0xff]  ;;  %v1372_v44 = vld [vmem:[%s2675_s3 + $0x138] sm:$0xff] }
  0x2b   :  { %1745 = vmatprep.subr.mxu1 %v1394_v13  ;;  %1690 = vmatpush3.msra.mxu0 %v1378_v12  ;;  %v2262_v42 = vsel %vm193_vm8, 1.0, %v1902_v3  ;;  %vm196_vm11 = vcmp.ge.f32.partialorder %v2279_v55, 1.0  ;;  %v207_v6 = vsub.f32 1.0, %v1337_v58  ;;  %216 = vst [vmem:[#allocation2 + $0x7a] sm:$0xff] %v1337_v58  ;;  %v156_v45 = vadd.f32 %v2200_v57, %v2098_v62  ;;  %v841_v49 = vld [vmem:[#allocation2 + $0x33] sm:$0xff]  ;;  %v843_v24 = vld [vmem:[#allocation2 + $0x4b] sm:$0xff] }
  0x2c   :  { %1746 = vmatpush3.msra.mxu1 %v1394_v13  ;;  %1691 = vmatprep.subr.mxu0 %v1377_v21  ;;  %v205_v51 = vsub.f32 1.0, %v2262_v42  ;;  %214 = vst [vmem:[#allocation2 + $0x62] sm:$0xff] %v2262_v42  ;;  %v1338_v7 = vsel %vm196_vm11, 1.0, %v1902_v3  ;;  %v210_v8 = vmul.f32 %v206_v59, %v2251_v30  ;;  %v244_v13 = vadd.f32 %v2238_v20, %v236_v56  ;;  %v1402_v30 = vld [vmem:[%s2675_s3 + $0x228] sm:$0xff] }
  0x2d   :  { %1747 = vmatprep.subr.mxu1 %v1393_v22  ;;  %1611 = vmatprep.mubr.f32.mxu0 %v324_v27  ;;  %v208_v11 = vsub.f32 1.0, %v1338_v7  ;;  %217 = vst [vmem:[#allocation2 + $0x82] sm:$0xff] %v1338_v7  ;;  %v211_v18 = vmul.f32 %v207_v6, %v2265_v43  ;;  %v157_v20 = vadd.f32 %v2214_v0, %v2107_v1 }
  0x2e   :  { %1667 = vmatprep.mubr.f32.mxu1 %v292_v29  ;;  %1692 = vmatpush3.msra.mxu0 %v1377_v21  ;;  %v209_v2 = vmul.f32 %v205_v51, %v2246_v23  ;;  %v246_v17 = vsub.f32 %v242_v60, %v210_v8  ;;  %v218_v27 = vadd.f32 %v2262_v42, %v154_v10  ;;  %v1371_v60 = vld [vmem:[%s2675_s3 + $0x130] sm:$0xff] }
  0x2f   :  { %1748 = vmatpush3.msra.mxu1 %v1393_v22  ;;  %1612 = vmatmul.mubr.f32.gmra.mxu0 %v325_v37  ;;  %v212_v53 = vmul.f32 %v208_v11, %v2279_v55  ;;  %v247_v22 = vsub.f32 %v243_v9, %v211_v18  ;;  %v219_v29 = vadd.f32 %v1336_v52, %v155_v14  ;;  %v1370_v11 = vld [vmem:[%s2675_s3 + $0x128] sm:$0xff]  ;;  %v1385_v14 = vld [vmem:[%s2675_s3 + $0x1a0] sm:$0xff]  ;;  %v1400_v55 = vld [vmem:[%s2675_s3 + $0x218] sm:$0xff] }
  0x30   :  { %1668 = vmatmul.mubr.f32.gmra.mxu1 %v293_v41  ;;  %1693 = vmatprep.subr.mxu0 %v1376_v48  ;;  %v245_v12 = vsub.f32 %v241_v36, %v209_v2  ;;  %v250_v21 = vmul.f32 0.5, %v246_v17  ;;  %v220_v41 = vadd.f32 %v1337_v58, %v156_v45  ;;  %v221_v52 = vadd.f32 %v1338_v7, %v157_v20  ;;  %v1367_v20 = vld [vmem:[%s2675_s3 + $0x110] sm:$0xff] }
  0x31   :  { %1749 = vmatprep.subr.mxu1 %v1392_v50  ;;  %1694 = vmatpush3.msra.mxu0 %v1376_v48  ;;  %v248_v57 = vsub.f32 %v244_v13, %v212_v53  ;;  %v251_v32 = vmul.f32 0.5, %v247_v22  ;;  %v1388_v48 = vld [vmem:[%s2675_s3 + $0x1b8] sm:$0xff]  ;;  %v1369_v13 = vld [vmem:[%s2675_s3 + $0x120] sm:$0xff] }
  0x32   :  { %1750 = vmatpush3.msra.mxu1 %v1392_v50  ;;  %1695 = vmatprep.subr.mxu0 %v1375_v61  ;;  %v249_v19 = vmul.f32 0.5, %v245_v12  ;;  %v2326_v31 = vadd.f32 %v250_v21, %v210_v8  ;;  %v330_v58 = vld [vmem:[#allocation2 + $0x79] sm:$0xff]  ;;  %v1386_v12 = vld [vmem:[%s2675_s3 + $0x1a8] sm:$0xff]  ;;  %v1383_v21 = vld [vmem:[%s2675_s3 + $0x190] sm:$0xff] }
  0x33   :  { %1751 = vmatprep.subr.mxu1 %v1391_v63  ;;  %1614 = vmatprep.mubr.f32.mxu0 %v326_v4  ;;  %v328_v1 = vld [vmem:[#allocation2 + $0x61] sm:$0xff]  ;;  %v252_v33 = vmul.f32 0.5, %v248_v57  ;;  %v329_v34 = vld [vmem:[#allocation2 + $0x69] sm:$0xff]  ;;  %v2333_v42 = vadd.f32 %v251_v32, %v211_v18 }
  0x34   :  { %1670 = vmatprep.mubr.f32.mxu1 %v294_v5  ;;  %1696 = vmatpush3.msra.mxu0 %v1375_v61  ;;  %v2324_v62 = vadd.f32 %v249_v19, %v209_v2  ;;  %v296_v0 = vld [vmem:[#allocation2 + $0x60] sm:$0xff]  ;;  %v297_v36 = vld [vmem:[#allocation2 + $0x68] sm:$0xff]  ;;  %vm258_vm13 = vcmp.ge.f32.partialorder %v2326_v31, 1.0  ;;  %v1387_v61 = vld [vmem:[%s2675_s3 + $0x1b0] sm:$0xff] }
  0x35   :  { %1752 = vmatpush3.msra.mxu1 %v1391_v63  ;;  %1615 = vmatmul.mubr.f32.gmra.mxu0 %v327_v15  ;;  %v1346_v51 = vsel %vm258_vm13, 1.0, %v1902_v3  ;;  %v2344_v56 = vadd.f32 %v252_v33, %v212_v53  ;;  %vm259_vm14 = vcmp.ge.f32.partialorder %v2333_v42, 1.0  ;;  %v298_v2 = vld [vmem:[#allocation2 + $0x78] sm:$0xff]  ;;  %v331_v8 = vld [vmem:[#allocation2 + $0x81] sm:$0xff] }
  0x36   :  { %1671 = vmatmul.mubr.f32.gmra.mxu1 %v295_v16  ;;  %1697 = vmatprep.subr.mxu0 %v1374_v47  ;;  %vm257_vm12 = vcmp.ge.f32.partialorder %v2324_v62, 1.0  ;;  %271 = vst [vmem:[#allocation2 + $0x9a] sm:$0xff] %v1346_v51  ;;  %v275_v59 = vadd.f32 %v1346_v51, %v219_v29  ;;  %v1347_v63 = vsel %vm259_vm14, 1.0, %v1902_v3  ;;  %v299_v9 = vld [vmem:[#allocation2 + $0x80] sm:$0xff]  ;;  %v1368_v19 = vld [vmem:[%s2675_s3 + $0x118] sm:$0xff]  ;;  %v1382_v29 = vld [vmem:[%s2675_s3 + $0x188] sm:$0xff] }
  0x37   :  { %1753 = vmatprep.subr.mxu1 %v1390_v38  ;;  %1698 = vmatpush3.msra.mxu0 %v1374_v47  ;;  %v1345_v37 = vsel %vm257_vm12, 1.0, %v1902_v3  ;;  %vm260_vm15 = vcmp.ge.f32.partialorder %v2344_v56, 1.0  ;;  %272 = vst [vmem:[#allocation2 + $0xaa] sm:$0xff] %v1347_v63  ;;  %v276_v5 = vadd.f32 %v1347_v63, %v220_v41  ;;  %v1384_v53 = vld [vmem:[%s2675_s3 + $0x198] sm:$0xff]  ;;  %v1365_v33 = vld [vmem:[%s2675_s3 + $0x100] sm:$0xff]  ;;  %v1903_v41 = vmov 1.0  }
  0x38   :  { %1754 = vmatpush3.msra.mxu1 %v1390_v38  ;;  %1699 = vmatprep.subr.mxu0 %v1373_v25  ;;  %270 = vst [vmem:[#allocation2 + $0x92] sm:$0xff] %v1345_v37  ;;  %v274_v50 = vadd.f32 %v1345_v37, %v218_v27  ;;  %v1348_v6 = vsel %vm260_vm15, 1.0, %v1902_v3  ;;  %v838_v37 = vld [vmem:[#allocation2 + $0xb] sm:$0xff]  ;;  %v1409_v51 = vld [vmem:[%s2675_s3 + $0x260] sm:$0xff] }
  0x39   :  { %1755 = vmatprep.subr.mxu1 %v1389_v26  ;;  %1617 = vmatprep.mubr.f32.mxu0 %v328_v1  ;;  %273 = vst [vmem:[#allocation2 + $0xb2] sm:$0xff] %v1348_v6  ;;  %v277_v7 = vadd.f32 %v1348_v6, %v221_v52  ;;  %v842_v52 = vld [vmem:[#allocation2 + $0x3b] sm:$0xff]  ;;  %v845_v39 = vld [vmem:[#allocation2 + $0x63] sm:$0xff]  ;;  %v846_v63 = vld [vmem:[#allocation2 + $0x6b] sm:$0xff] }
  0x3a   :  { %1673 = vmatprep.mubr.f32.mxu1 %v296_v0  ;;  %1700 = vmatpush3.msra.mxu0 %v1373_v25  ;;  %v278_v4 = vadd.f32 %v275_v59, %v274_v50  ;;  %v1366_v0 = vld [vmem:[%s2675_s3 + $0x108] sm:$0xff]  ;;  %v839_v50 = vld [vmem:[#allocation2 + $0x1b] sm:$0xff]  ;;  %v1407_v59 = vld [vmem:[%s2675_s3 + $0x250] sm:$0xff] }
  0x3b   :  { %1756 = vmatpush3.msra.mxu1 %v1389_v26  ;;  %1618 = vmatmul.mubr.f32.gmra.mxu0 %v329_v34  ;;  %v1381_v34 = vld [vmem:[%s2675_s3 + $0x180] sm:$0xff]  ;;  %v1399_v6 = vld [vmem:[%s2675_s3 + $0x210] sm:$0xff]  ;;  %v1398_v31 = vld [vmem:[%s2675_s3 + $0x208] sm:$0xff] }
  0x3c   :  { %1674 = vmatmul.mubr.f32.gmra.mxu1 %v297_v36  ;;  %1701 = vmatprep.subr.mxu0 %v1372_v44  ;;  %v279_v10 = vadd.f32 %v278_v4, %v276_v5  ;;  %v837_v36 = vld [vmem:[#allocation2 + $0x3] sm:$0xff]  ;;  %v847_v23 = vld [vmem:[#allocation2 + $0x7b] sm:$0xff] }
  0x3d   :  { %1757 = vmatprep.subr.mxu1 %v1388_v48  ;;  %1702 = vmatpush3.msra.mxu0 %v1372_v44  ;;  %v1412_v44 = vld [vmem:[%s2675_s3 + $0x278] sm:$0xff]  ;;  %v1401_v4 = vld [vmem:[%s2675_s3 + $0x220] sm:$0xff] }
  0x3e   :  { %1758 = vmatpush3.msra.mxu1 %v1388_v48  ;;  %1703 = vmatprep.subr.mxu0 %v1371_v60  ;;  %v280_v3 = vadd.f32 %v279_v10, %v277_v7  ;;  %v334_v22 = vld [vmem:[#allocation2 + $0xa9] sm:$0xff]  ;;  %v850_v5 = vld [vmem:[#allocation2 + $0x9b] sm:$0xff] }
  0x3f   :  { %1759 = vmatprep.subr.mxu1 %v1387_v61  ;;  %1620 = vmatprep.mubr.f32.mxu0 %v330_v58  ;;  %v332_v15 = vld [vmem:[#allocation2 + $0x91] sm:$0xff]  ;;  %v333_v18 = vld [vmem:[#allocation2 + $0x99] sm:$0xff]  ;;  %v302_v25 = vld [vmem:[#allocation2 + $0xa8] sm:$0xff] }
  0x40   :  { %1676 = vmatprep.mubr.f32.mxu1 %v298_v2  ;;  %1704 = vmatpush3.msra.mxu0 %v1371_v60  ;;  %v300_v16 = vld [vmem:[#allocation2 + $0x90] sm:$0xff]  ;;  %v281_v17 = vrot.slane %v280_v3, 4  ;;  %v301_v47 = vld [vmem:[#allocation2 + $0x98] sm:$0xff]  ;;  %v848_v2 = vld [vmem:[#allocation2 + $0x83] sm:$0xff] }
  0x41   :  { %1760 = vmatpush3.msra.mxu1 %v1387_v61  ;;  %1621 = vmatmul.mubr.f32.gmra.mxu0 %v331_v8  ;;  %v335_v57 = vld [vmem:[#allocation2 + $0xb1] sm:$0xff]  ;;  %v1405_v61 = vld [vmem:[%s2675_s3 + $0x240] sm:$0xff] }
  0x42   :  { %1677 = vmatmul.mubr.f32.gmra.mxu1 %v299_v9  ;;  %1705 = vmatprep.subr.mxu0 %v1370_v11  ;;  %v282_v38 = vadd.f32 %v281_v17, %v280_v3  ;;  %v303_v1 = vld [vmem:[#allocation2 + $0xb0] sm:$0xff]  ;;  %v1397_v8 = vld [vmem:[%s2675_s3 + $0x200] sm:$0xff] }
  0x43   :  { %1761 = vmatprep.subr.mxu1 %v1386_v12  ;;  %1706 = vmatpush3.msra.mxu0 %v1370_v11  ;;  %v1411_v48 = vld [vmem:[%s2675_s3 + $0x270] sm:$0xff]  ;;  %v1031_v42 = vld [vmem:[#allocation2 + $0x4] sm:$0xff]  ;;  %v1041_v56 = vld [vmem:[#allocation2 + $0x7c] sm:$0xff] }
  0x44   :  { %1762 = vmatpush3.msra.mxu1 %v1386_v12  ;;  %1707 = vmatprep.subr.mxu0 %v1369_v13  ;;  %v283_v45 = vrot.slane %v282_v38, 2  ;;  %v844_v60 = vld [vmem:[#allocation2 + $0x53] sm:$0xff]  ;;  %v851_v62 = vld [vmem:[#allocation2 + $0xab] sm:$0xff]  ;;  %v1033_v12 = vld [vmem:[#allocation2 + $0x1c] sm:$0xff] }
  0x45   :  { %1763 = vmatprep.subr.mxu1 %v1385_v14  ;;  %1623 = vmatprep.mubr.f32.mxu0 %v332_v15  ;;  %v1403_v58 = vld [vmem:[%s2675_s3 + $0x230] sm:$0xff]  ;;  %v1039_v9 = vld [vmem:[#allocation2 + $0x64] sm:$0xff]  ;;  %v1044_v17 = vld [vmem:[#allocation2 + $0x9c] sm:$0xff] }
  0x46   :  { %1679 = vmatprep.mubr.f32.mxu1 %v300_v16  ;;  %1708 = vmatpush3.msra.mxu0 %v1369_v13  ;;  %v284_v26 = vadd.f32 %v283_v45, %v282_v38  ;;  %v849_v43 = vld [vmem:[#allocation2 + $0x93] sm:$0xff]  ;;  %v1034_v3 = vld [vmem:[#allocation2 + $0x24] sm:$0xff]  ;;  %v1036_v16 = vld [vmem:[#allocation2 + $0x3c] sm:$0xff] }
  0x47   :  { %1764 = vmatpush3.msra.mxu1 %v1385_v14  ;;  %1624 = vmatmul.mubr.f32.gmra.mxu0 %v333_v18  ;;  %v852_v7 = vld [vmem:[#allocation2 + $0xb3] sm:$0xff]  ;;  %v1042_v13 = vld [vmem:[#allocation2 + $0x84] sm:$0xff] }
  0x48   :  { %1680 = vmatmul.mubr.f32.gmra.mxu1 %v301_v47  ;;  %1709 = vmatprep.subr.mxu0 %v1368_v19  ;;  %v285_v27 = vrot.slane %v284_v26, 1  ;;  %v1032_v10 = vld [vmem:[#allocation2 + $0xc] sm:$0xff]  ;;  %v1035_v14 = vld [vmem:[#allocation2 + $0x34] sm:$0xff] }
  0x49   :  { %1765 = vmatprep.subr.mxu1 %v1384_v53  ;;  %1710 = vmatpush3.msra.mxu0 %v1368_v19  ;;  %v1040_v11 = vld [vmem:[#allocation2 + $0x6c] sm:$0xff]  ;;  %v1043_v15 = vld [vmem:[#allocation2 + $0x94] sm:$0xff] }
  0x4a   :  { %1766 = vmatpush3.msra.mxu1 %v1384_v53  ;;  %1711 = vmatprep.subr.mxu0 %v1367_v20  ;;  %v286_v32 = vadd.f32 %v285_v27, %v284_v26  ;;  %v1037_v18 = vld [vmem:[#allocation2 + $0x4c] sm:$0xff]  ;;  %v1038_v38 = vld [vmem:[#allocation2 + $0x54] sm:$0xff] }
  0x4b   :  { %1767 = vmatprep.subr.mxu1 %v1383_v21  ;;  %1626 = vmatprep.mubr.f32.mxu0 %v334_v22  ;;  %v1045_v47 = vld [vmem:[#allocation2 + $0xac] sm:$0xff]  ;;  %v1046_v19 = vld [vmem:[#allocation2 + $0xb4] sm:$0xff] }
  0x4c   :  { %1682 = vmatprep.mubr.f32.mxu1 %v302_v25  ;;  %1712 = vmatpush3.msra.mxu0 %v1367_v20  ;;  %287 = vst [vmem:[%s2679_s6] sm:$0x1] %v286_v32 }
  0x4d   :  { %1768 = vmatpush3.msra.mxu1 %v1383_v21  ;;  %1627 = vmatmul.mubr.f32.gmra.mxu0 %v335_v57 }
  0x4e   :  { %1683 = vmatmul.mubr.f32.gmra.mxu1 %v303_v1  ;;  %1713 = vmatprep.subr.mxu0 %v1366_v0 }
  0x4f   :  { %1769 = vmatprep.subr.mxu1 %v1382_v29  ;;  %1714 = vmatpush3.msra.mxu0 %v1366_v0 }
  0x50   :  { %1770 = vmatpush3.msra.mxu1 %v1382_v29  ;;  %1715 = vmatprep.subr.mxu0 %v1365_v33 }
  0x51   :  { %1771 = vmatprep.subr.mxu1 %v1381_v34  ;;  %1716 = vmatpush3.msra.mxu0 %v1365_v33 }
  0x52   :  { %1886 = vmatprep.mubr.msk.f32.mxu0 %vm66_vm0, %v1903_v41  ;;  %1772 = vmatpush3.msra.mxu1 %v1381_v34 }
  0x53   :  { %1773 = vmatprep.mubr.f32.mxu1 %v837_v36  ;;  %1887 = vmatmul.mubr.msk.f32.vlgmr.msra.gmra.mxu0 %vm67_vm1, %v1903_v41 }
  0x54   :  { %1774 = vmatmul.mubr.f32.vlgmr.msra.gmra.mxu1 %v838_v37  ;;  %1797 = vmatprep.subr.mxu0 %v1412_v44 }
  0x55   :  { %1853 = vmatprep.subr.mxu1 %v1412_v44  ;;  %1798 = vmatpush3.msra.mxu0 %v1412_v44 }
  0x56   :  { %1869 = vmatpush3.msra.mxu1 %v1412_v44  ;;  %1799 = vmatprep.subr.mxu0 %v1411_v48 }
  0x57   :  { %1854 = vmatprep.subr.mxu1 %v1411_v48  ;;  %1888 = vmatprep.mubr.msk.f32.mxu0 %vm68_vm2, %v1903_v41 }
  0x58   :  { %1776 = vmatprep.mubr.f32.mxu1 %v839_v50  ;;  %1800 = vmatpush3.msra.mxu0 %v1411_v48 }
  0x59   :  { %1870 = vmatpush3.msra.mxu1 %v1411_v48  ;;  %1889 = vmatmul.mubr.msk.f32.gmra.mxu0 %vm69_vm3, %v1903_v41 }
  0x5a   :  { %1777 = vmatmul.mubr.f32.gmra.mxu1 %v840_v35  ;;  %1801 = vmatprep.subr.mxu0 %v1410_v40 }
  0x5b   :  { %1855 = vmatprep.subr.mxu1 %v1410_v40  ;;  %1802 = vmatpush3.msra.mxu0 %v1410_v40 }
  0x5c   :  { %1871 = vmatpush3.msra.mxu1 %v1410_v40  ;;  %1803 = vmatprep.subr.mxu0 %v1409_v51 }
  0x5d   :  { %1856 = vmatprep.subr.mxu1 %v1409_v51  ;;  %1890 = vmatprep.mubr.msk.f32.mxu0 %vm129_vm4, %v1903_v41 }
  0x5e   :  { %1779 = vmatprep.mubr.f32.mxu1 %v841_v49  ;;  %1804 = vmatpush3.msra.mxu0 %v1409_v51 }
  0x5f   :  { %1872 = vmatpush3.msra.mxu1 %v1409_v51  ;;  %1891 = vmatmul.mubr.msk.f32.gmra.mxu0 %vm130_vm5, %v1903_v41 }
  0x60   :  { %1780 = vmatmul.mubr.f32.gmra.mxu1 %v842_v52  ;;  %1805 = vmatprep.subr.mxu0 %v1408_v54 }
  0x61   :  { %1857 = vmatprep.subr.mxu1 %v1408_v54  ;;  %1806 = vmatpush3.msra.mxu0 %v1408_v54 }
  0x62   :  { %1873 = vmatpush3.msra.mxu1 %v1408_v54  ;;  %1807 = vmatprep.subr.mxu0 %v1407_v59 }
  0x63   :  { %1858 = vmatprep.subr.mxu1 %v1407_v59  ;;  %1892 = vmatprep.mubr.msk.f32.mxu0 %vm131_vm6, %v1903_v41 }
  0x64   :  { %1782 = vmatprep.mubr.f32.mxu1 %v843_v24  ;;  %1808 = vmatpush3.msra.mxu0 %v1407_v59 }
  0x65   :  { %1874 = vmatpush3.msra.mxu1 %v1407_v59  ;;  %1893 = vmatmul.mubr.msk.f32.gmra.mxu0 %vm132_vm7, %v1903_v41 }
  0x66   :  { %1783 = vmatmul.mubr.f32.gmra.mxu1 %v844_v60  ;;  %1809 = vmatprep.subr.mxu0 %v1406_v28 }
  0x67   :  { %1859 = vmatprep.subr.mxu1 %v1406_v28  ;;  %1810 = vmatpush3.msra.mxu0 %v1406_v28 }
  0x68   :  { %1875 = vmatpush3.msra.mxu1 %v1406_v28  ;;  %1811 = vmatprep.subr.mxu0 %v1405_v61 }
  0x69   :  { %1860 = vmatprep.subr.mxu1 %v1405_v61  ;;  %1894 = vmatprep.mubr.msk.f32.mxu0 %vm193_vm8, %v1903_v41 }
  0x6a   :  { %1785 = vmatprep.mubr.f32.mxu1 %v845_v39  ;;  %1812 = vmatpush3.msra.mxu0 %v1405_v61 }
  0x6b   :  { %1876 = vmatpush3.msra.mxu1 %v1405_v61  ;;  %1895 = vmatmul.mubr.msk.f32.gmra.mxu0 %vm194_vm9, %v1903_v41 }
  0x6c   :  { %1786 = vmatmul.mubr.f32.gmra.mxu1 %v846_v63  ;;  %1813 = vmatprep.subr.mxu0 %v1404_v46 }
  0x6d   :  { %1861 = vmatprep.subr.mxu1 %v1404_v46  ;;  %1814 = vmatpush3.msra.mxu0 %v1404_v46 }
  0x6e   :  { %1877 = vmatpush3.msra.mxu1 %v1404_v46  ;;  %1815 = vmatprep.subr.mxu0 %v1403_v58 }
  0x6f   :  { %1862 = vmatprep.subr.mxu1 %v1403_v58  ;;  %1896 = vmatprep.mubr.msk.f32.mxu0 %vm195_vm10, %v1903_v41 }
  0x70   :  { %1788 = vmatprep.mubr.f32.mxu1 %v847_v23  ;;  %1816 = vmatpush3.msra.mxu0 %v1403_v58 }
  0x71   :  { %1878 = vmatpush3.msra.mxu1 %v1403_v58  ;;  %1897 = vmatmul.mubr.msk.f32.gmra.mxu0 %vm196_vm11, %v1903_v41 }
  0x72   :  { %1789 = vmatmul.mubr.f32.gmra.mxu1 %v848_v2  ;;  %1817 = vmatprep.subr.mxu0 %v1402_v30 }
  0x73   :  { %1863 = vmatprep.subr.mxu1 %v1402_v30  ;;  %1818 = vmatpush3.msra.mxu0 %v1402_v30 }
  0x74   :  { %1879 = vmatpush3.msra.mxu1 %v1402_v30  ;;  %1819 = vmatprep.subr.mxu0 %v1401_v4 }
  0x75   :  { %1864 = vmatprep.subr.mxu1 %v1401_v4  ;;  %1898 = vmatprep.mubr.msk.f32.mxu0 %vm257_vm12, %v1903_v41 }
  0x76   :  { %1791 = vmatprep.mubr.f32.mxu1 %v849_v43  ;;  %1820 = vmatpush3.msra.mxu0 %v1401_v4 }
  0x77   :  { %1880 = vmatpush3.msra.mxu1 %v1401_v4  ;;  %1899 = vmatmul.mubr.msk.f32.gmra.mxu0 %vm258_vm13, %v1903_v41 }
  0x78   :  { %1792 = vmatmul.mubr.f32.gmra.mxu1 %v850_v5  ;;  %1821 = vmatprep.subr.mxu0 %v1400_v55 }
  0x79   :  { %1865 = vmatprep.subr.mxu1 %v1400_v55  ;;  %1822 = vmatpush3.msra.mxu0 %v1400_v55 }
  0x7a   :  { %1881 = vmatpush3.msra.mxu1 %v1400_v55  ;;  %1823 = vmatprep.subr.mxu0 %v1399_v6 }
  0x7b   :  { %1866 = vmatprep.subr.mxu1 %v1399_v6  ;;  %1900 = vmatprep.mubr.msk.f32.mxu0 %vm259_vm14, %v1903_v41 }
  0x7c   :  { %1794 = vmatprep.mubr.f32.mxu1 %v851_v62  ;;  %1824 = vmatpush3.msra.mxu0 %v1399_v6 }
  0x7d   :  { %1882 = vmatpush3.msra.mxu1 %v1399_v6  ;;  %1901 = vmatmul.mubr.msk.f32.gmra.mxu0 %vm260_vm15, %v1903_v41 }
  0x7e   :  { %1795 = vmatmul.mubr.f32.gmra.mxu1 %v852_v7  ;;  %1825 = vmatprep.subr.mxu0 %v1398_v31 }
  0x7f   :  { %1867 = vmatprep.subr.mxu1 %v1398_v31  ;;  %1826 = vmatpush3.msra.mxu0 %v1398_v31 }
  0x80   :  { %1883 = vmatpush3.msra.mxu1 %v1398_v31  ;;  %1827 = vmatprep.subr.mxu0 %v1397_v8 }
  0x81   :  { %1868 = vmatprep.subr.mxu1 %v1397_v8  ;;  %1828 = vmatpush3.msra.mxu0 %v1397_v8 }
  0x82   :  { %1884 = vmatpush3.msra.mxu1 %v1397_v8  ;;  %1829 = vmatprep.mubr.f32.mxu0 %v1031_v42 }
  0x83   :  { %1841 = vmatprep.mubr.f32.mxu1 %v1039_v9  ;;  %1830 = vmatmul.mubr.f32.vlgmr.msra.gmra.mxu0 %v1032_v10 }
  0x84   :  { %1842 = vmatmul.mubr.f32.vlgmr.msra.gmra.mxu1 %v1040_v11  ;;  %1832 = vmatprep.mubr.f32.mxu0 %v1033_v12 }
  0x85   :  { %1844 = vmatprep.mubr.f32.mxu1 %v1041_v56 }
  0x87   :  { %1833 = vmatmul.mubr.f32.gmra.mxu0 %v1034_v3 }
  0x88   :  { %1845 = vmatmul.mubr.f32.gmra.mxu1 %v1042_v13  ;;  %1835 = vmatprep.mubr.f32.mxu0 %v1035_v14 }
  0x89   :  { %1847 = vmatprep.mubr.f32.mxu1 %v1043_v15 }
  0x8b   :  { %1836 = vmatmul.mubr.f32.gmra.mxu0 %v1036_v16 }
  0x8c   :  { %1848 = vmatmul.mubr.f32.gmra.mxu1 %v1044_v17  ;;  %1838 = vmatprep.mubr.f32.mxu0 %v1037_v18 }
  0x8d   :  { %1850 = vmatprep.mubr.f32.mxu1 %v1045_v47 }
  0x8f   :  { %1839 = vmatmul.mubr.f32.gmra.mxu0 %v1038_v38 }
  0x90   :  { %1851 = vmatmul.mubr.f32.gmra.mxu1 %v1046_v19 }
  0xe3   :  { %v1607_v53 = vpop.f32.mrf.mxu0 }
  0xe4   :  { %v1663_v45 = vpop.f32.mrf.mxu1 }
  0xe5   :  { %v419_v20 = vpop.f32.mrf.mxu0  ;;  %v570_v18 = vadd.f32 %v1663_v45, %v1607_v53 }
  0xe6   :  { %v564_v21 = vpop.f32.mrf.mxu1 }
  0xe7   :  { %v565_v38 = vadd.f32 %v564_v21, %v419_v20 }
  0xe9   :  { %v2495_v22 = vpop.f32.mrf.mxu0 }
  0xea   :  { %v2497_v25 = vpop.f32.mrf.mxu1 }
  0xeb   :  { %v2499_v26 = vpop.f32.mrf.mxu0 }
  0xec   :  { %v2501_v27 = vpop.f32.mrf.mxu1 }
  0xed   :  { %v575_v53 = vadd.f32 %v2501_v27, %v2499_v26 }
  0xef   :  { %v2503_v57 = vpop.f32.mrf.mxu0 }
  0xf0   :  { %v2505_v1 = vpop.f32.mrf.mxu1 }
  0xf1   :  { %v2507_v0 = vpop.f32.mrf.mxu0  ;;  %v590_v45 = vadd.f32 %v2505_v1, %v2503_v57 }
  0xf2   :  { %v2509_v29 = vpop.f32.mrf.mxu1 }
  0xf3   :  { %v585_v20 = vadd.f32 %v2509_v29, %v2507_v0 }
  0xf5   :  { %v2511_v32 = vpop.f32.mrf.mxu0 }
  0xf6   :  { %v2513_v33 = vpop.f32.mrf.mxu1 }
  0xf7   :  { %v2515_v34 = vpop.f32.mrf.mxu0 }
  0xf8   :  { %v2517_v36 = vpop.f32.mrf.mxu1 }
  0xf9   :  { %v595_v1 = vadd.f32 %v2517_v36, %v2515_v34 }
  0xfb   :  { %v1619_v37 = vpop.f32.mrf.mxu0 }
  0xfc   :  { %v1675_v41 = vpop.f32.mrf.mxu1 }
  0xfd   :  { %v459_v44 = vpop.f32.mrf.mxu0  ;;  %v610_v47 = vadd.f32 %v1675_v41, %v1619_v37 }
  0xfe   :  { %v604_v48 = vpop.f32.mrf.mxu1 }
 0x101   :  { %v1622_v50 = vpop.f32.mrf.mxu0 }
 0x102   :  { %v1678_v35 = vpop.f32.mrf.mxu1 }
 0x103   :  { %v469_v40 = vpop.f32.mrf.mxu0  ;;  %v620_v21 = vadd.f32 %v1678_v35, %v1622_v50 }
 0x104   :  { %v614_v51 = vpop.f32.mrf.mxu1 }
 0x105   :  { %v615_v37 = vadd.f32 %v614_v51, %v469_v40 }
 0x107   :  { %v2519_v49 = vpop.f32.mrf.mxu0 }
 0x108   :  { %v2521_v52 = vpop.f32.mrf.mxu1 }
 0x109   :  { %v2523_v54 = vpop.f32.mrf.mxu0  ;;  %v630_v0 = vadd.f32 %v2521_v52, %v2519_v49 }
 0x10a   :  { %v2525_v59 = vpop.f32.mrf.mxu1 }
 0x10b   :  { %v625_v29 = vadd.f32 %v2525_v59, %v2523_v54 }
 0x10d   :  { %v2527_v24 = vpop.f32.mrf.mxu0 }
 0x10e   :  { %v2529_v60 = vpop.f32.mrf.mxu1 }
 0x10f   :  { %v2531_v28 = vpop.f32.mrf.mxu0  ;;  %v640_v35 = vadd.f32 %v2529_v60, %v2527_v24 }
 0x110   :  { %v2533_v61 = vpop.f32.mrf.mxu1 }
 0x111   :  { %v635_v51 = vadd.f32 %v2533_v61, %v2531_v28 }
 0x113   :  { %v1719_v39 = vpop.f32.mrf.mxu0 }
 0x114   :  { %v1775_v63 = vpop.f32.mrf.mxu1 }
 0x115   :  { %v742_v46 = vpop.f32.mrf.mxu0 }
 0x116   :  { %v936_v58 = vpop.f32.mrf.mxu1 }
 0x119   :  { %v1722_v23 = vpop.f32.mrf.mxu0 }
 0x11a   :  { %v1778_v2 = vpop.f32.mrf.mxu1 }
 0x11b   :  { %v752_v30 = vpop.f32.mrf.mxu0 }
 0x11c   :  { %v2535_v4 = vpop.f32.mrf.mxu1 }
 0x11d   :  { %2682 = vst [vmem:[#allocation3_spill] sm:$0xff] %v2535_v4 }
 0x11f   :  { %v1725_v43 = vpop.f32.mrf.mxu0 }
 0x120   :  { %v2537_v5 = vpop.f32.mrf.mxu1 }
 0x121   :  { %2683 = vst [vmem:[#allocation4_spill] sm:$0xff] %v2537_v5  ;;  %v2539_v55 = vpop.f32.mrf.mxu0 }
 0x122   :  { %2684 = vst [vmem:[#allocation5_spill] sm:$0xff] %v2539_v55  ;;  %v2541_v6 = vpop.f32.mrf.mxu1 }
 0x123   :  { %2685 = vst [vmem:[#allocation6_spill] sm:$0xff] %v2541_v6 }
 0x125   :  { %v2543_v62 = vpop.f32.mrf.mxu0 }
 0x126   :  { %2686 = vst [vmem:[#allocation7_spill] sm:$0xff] %v2543_v62  ;;  %v2545_v7 = vpop.f32.mrf.mxu1  ;;  %v821_v62 = vadd.f32 %v742_v46, %v565_v38 }
 0x127   :  { %2687 = vst [vmem:[#allocation8_spill] sm:$0xff] %v2545_v7  ;;  %v2547_v31 = vpop.f32.mrf.mxu0  ;;  %v605_v7 = vadd.f32 %v604_v48, %v459_v44 }
 0x128   :  { %2688 = vst [vmem:[#allocation9_spill] sm:$0xff] %v2547_v31  ;;  %v2549_v8 = vpop.f32.mrf.mxu1  ;;  %v822_v31 = vadd.f32 %v1719_v39, %v570_v18  ;;  %v600_v39 = vadd.f32 %v2513_v33, %v2511_v32  ;;  %v1015_v46 = vadd.f32 %v936_v58, %v821_v62  ;;  %v826_v32 = vadd.f32 %v1725_v43, %v590_v45  ;;  %v2693_v61 = vld [vmem:[#allocation4_spill] sm:$0xff] }
 0x129   :  { %2689 = vst [vmem:[#allocation10_spill] sm:$0xff] %v2549_v8  ;;  %v2691_v49 = vld [vmem:[#allocation5_spill] sm:$0xff] }
 0x12a   :  { %v1016_v41 = vadd.f32 %v1775_v63, %v822_v31  ;;  %v825_v52 = vadd.f32 %v2691_v49, %v585_v20  ;;  %v2692_v63 = vld [vmem:[#allocation3_spill] sm:$0xff] }
 0x12b   :  { %v1731_v42 = vpop.f32.mrf.mxu0 }
 0x12c   :  { %v1787_v9 = vpop.f32.mrf.mxu1  ;;  %v830_v6 = vadd.f32 %v1731_v42, %v610_v47 }
 0x12d   :  { %v782_v10 = vpop.f32.mrf.mxu0  ;;  %v2694_v43 = vld [vmem:[#allocation7_spill] sm:$0xff] }
 0x12e   :  { %v976_v11 = vpop.f32.mrf.mxu1  ;;  %v829_v55 = vadd.f32 %v782_v10, %v605_v7  ;;  %v1024_v48 = vadd.f32 %v1787_v9, %v830_v6 }
 0x130   :  { %v1023_v26 = vadd.f32 %v976_v11, %v829_v55  ;;  %v828_v55 = vadd.f32 %v2694_v43, %v600_v39 }
 0x131   :  { %v1734_v12 = vpop.f32.mrf.mxu0 }
 0x132   :  { %v1790_v56 = vpop.f32.mrf.mxu1 }
 0x133   :  { %v792_v3 = vpop.f32.mrf.mxu0 }
 0x134   :  { %v986_v13 = vpop.f32.mrf.mxu1  ;;  %v831_v27 = vadd.f32 %v792_v3, %v615_v37 }
 0x137   :  { %v1737_v14 = vpop.f32.mrf.mxu0 }
 0x138   :  { %v2551_v15 = vpop.f32.mrf.mxu1  ;;  %v834_v59 = vadd.f32 %v1737_v14, %v630_v0 }
 0x139   :  { %2690 = vst [vmem:[#allocation11_spill] sm:$0xff] %v2551_v15  ;;  %v802_v16 = vpop.f32.mrf.mxu0  ;;  %v580_v15 = vadd.f32 %v2497_v25, %v2495_v22  ;;  %v823_v22 = vadd.f32 %v752_v30, %v575_v53  ;;  %v832_v25 = vadd.f32 %v1734_v12, %v620_v21  ;;  %v1020_v30 = vadd.f32 %v2693_v61, %v826_v32 }
 0x13a   :  { %v2553_v17 = vpop.f32.mrf.mxu1  ;;  %v833_v6 = vadd.f32 %v802_v16, %v625_v29 }
 0x13b   :  { %v824_v44 = vadd.f32 %v1722_v23, %v580_v15  ;;  %v1026_v54 = vadd.f32 %v1790_v56, %v832_v25  ;;  %v1017_v58 = vadd.f32 %v2692_v63, %v823_v22  ;;  %v1025_v23 = vadd.f32 %v986_v13, %v831_v27  ;;  %v2695_v13 = vld [vmem:[#allocation6_spill] sm:$0xff]  ;;  %v2696_v15 = vld [vmem:[#allocation9_spill] sm:$0xff] }
 0x13c   :  { %v1019_v14 = vadd.f32 %v2695_v13, %v825_v52  ;;  %v827_v18 = vadd.f32 %v2696_v15, %v595_v1 }
 0x13d   :  { %v2555_v19 = vpop.f32.mrf.mxu0  ;;  %v1018_v40 = vadd.f32 %v1778_v2, %v824_v44 }
 0x13e   :  { %v2557_v8 = vpop.f32.mrf.mxu1  ;;  %v836_v16 = vadd.f32 %v2555_v19, %v640_v35 }
 0x13f   :  { %v2559_v5 = vpop.f32.mrf.mxu0 }
 0x140   :  { %v2561_v4 = vpop.f32.mrf.mxu1  ;;  %v2697_v47 = vld [vmem:[#allocation11_spill] sm:$0xff]  ;;  %v835_v39 = vadd.f32 %v2559_v5, %v635_v51  ;;  %v1030_v0 = vadd.f32 %v2557_v8, %v836_v16 }
 0x141   :  { %v1028_v38 = vadd.f32 %v2697_v47, %v834_v59 }
 0x143   :  { %v1831_v7 = vpop.f32.mrf.mxu0 }
 0x144   :  { %v1843_v42 = vpop.f32.mrf.mxu1  ;;  %v1210_v10 = vadd.f32 %v1831_v7, %v1016_v41  ;;  %v2698_v41 = vld [vmem:[#allocation8_spill] sm:$0xff] }
 0x145   :  { %v2573_v57 = vadd.f32 %v1843_v42, %v1024_v48  ;;  %v1130_v33 = vpop.f32.mrf.mxu0  ;;  %v1022_v44 = vadd.f32 %v2698_v41, %v828_v55  ;;  %v1027_v48 = vadd.f32 %v2553_v17, %v833_v6 }
 0x146   :  { %v1170_v50 = vpop.f32.mrf.mxu1  ;;  %1226 = vst [vmem:[%s2680_s4 + $0x8] sm:$0xff] %v1210_v10  ;;  %v1209_v34 = vadd.f32 %v1130_v33, %v1015_v46  ;;  %v1264_v11 = vmul.f32 %v1210_v10, %v1210_v10 }
 0x147   :  { %1234 = vst [vmem:[%s2680_s4 + $0x48] sm:$0xff] %v2573_v57  ;;  %v2590_v36 = vadd.f32 %v1170_v50, %v1023_v26  ;;  %v1834_v24 = vpop.f32.mrf.mxu0  ;;  %v1272_v43 = vmul.f32 %v2573_v57, %v2573_v57 }
 0x148   :  { %v1846_v60 = vpop.f32.mrf.mxu1  ;;  %1225 = vst [vmem:[%s2680_s4] sm:$0xff] %v1209_v34  ;;  %v1263_v2 = vmul.f32 %v1209_v34, %v1209_v34  ;;  %v1212_v28 = vadd.f32 %v1834_v24, %v1018_v40  ;;  %v1241_v12 = vadd.f32 %v1210_v10, %v1209_v34  ;;  %v2699_v10 = vld [vmem:[#allocation10_spill] sm:$0xff]  ;;  %v1029_v40 = vadd.f32 %v2561_v4, %v835_v39 }
 0x149   :  { %1233 = vst [vmem:[%s2680_s4 + $0x40] sm:$0xff] %v2590_v36  ;;  %v2605_v62 = vadd.f32 %v1846_v60, %v1026_v54  ;;  %v1140_v31 = vpop.f32.mrf.mxu0  ;;  %v1021_v1 = vadd.f32 %v2699_v10, %v827_v18 }
 0x14a   :  { %v1180_v9 = vpop.f32.mrf.mxu1  ;;  %1228 = vst [vmem:[%s2680_s4 + $0x18] sm:$0xff] %v1212_v28  ;;  %v1211_v56 = vadd.f32 %v1140_v31, %v1017_v58  ;;  %v1279_v20 = vadd.f32 %v1264_v11, %v1263_v2  ;;  %v1266_v7 = vmul.f32 %v1212_v28, %v1212_v28 }
 0x14b   :  { %v2610_v3 = vadd.f32 %v1180_v9, %v1025_v23  ;;  %1236 = vst [vmem:[%s2680_s4 + $0x58] sm:$0xff] %v2605_v62  ;;  %v1837_v53 = vpop.f32.mrf.mxu0 }
 0x14c   :  { %v1849_v45 = vpop.f32.mrf.mxu1  ;;  %1227 = vst [vmem:[%s2680_s4 + $0x10] sm:$0xff] %v1211_v56  ;;  %v1242_v21 = vadd.f32 %v1241_v12, %v1211_v56  ;;  %v1265_v37 = vmul.f32 %v1211_v56, %v1211_v56  ;;  %v1214_v19 = vadd.f32 %v1837_v53, %v1020_v30  ;;  %v1274_v12 = vmul.f32 %v2605_v62, %v2605_v62 }
 0x14d   :  { %1235 = vst [vmem:[%s2680_s4 + $0x50] sm:$0xff] %v2610_v3  ;;  %v1222_v46 = vadd.f32 %v1849_v45, %v1028_v38  ;;  %v1150_v22 = vpop.f32.mrf.mxu0  ;;  %v1273_v31 = vmul.f32 %v2610_v3, %v2610_v3 }
 0x14e   :  { %v1190_v25 = vpop.f32.mrf.mxu1  ;;  %v1280_v42 = vadd.f32 %v1279_v20, %v1265_v37  ;;  %1230 = vst [vmem:[%s2680_s4 + $0x28] sm:$0xff] %v1214_v19  ;;  %v1213_v26 = vadd.f32 %v1150_v22, %v1019_v14  ;;  %v1243_v27 = vadd.f32 %v1242_v21, %v1212_v28  ;;  %v1268_v49 = vmul.f32 %v1214_v19, %v1214_v19 }
 0x14f   :  { %1238 = vst [vmem:[%s2680_s4 + $0x68] sm:$0xff] %v1222_v46  ;;  %v1221_v5 = vadd.f32 %v1190_v25, %v1027_v48  ;;  %v1840_v17 = vpop.f32.mrf.mxu0  ;;  %v1271_v28 = vmul.f32 %v2590_v36, %v2590_v36  ;;  %v1276_v18 = vmul.f32 %v1222_v46, %v1222_v46 }
 0x150   :  { %v1852_v29 = vpop.f32.mrf.mxu1  ;;  %1229 = vst [vmem:[%s2680_s4 + $0x20] sm:$0xff] %v1213_v26  ;;  %v1244_v32 = vadd.f32 %v1243_v27, %v1213_v26  ;;  %v1267_v33 = vmul.f32 %v1213_v26, %v1213_v26  ;;  %v1281_v50 = vadd.f32 %v1280_v42, %v1266_v7  ;;  %v1216_v35 = vadd.f32 %v1840_v17, %v1022_v44 }
 0x151   :  { %1237 = vst [vmem:[%s2680_s4 + $0x60] sm:$0xff] %v1221_v5  ;;  %v1224_v8 = vadd.f32 %v1852_v29, %v1030_v0  ;;  %v1160_v34 = vpop.f32.mrf.mxu0 }
 0x152   :  { %v1200_v51 = vpop.f32.mrf.mxu1  ;;  %v1282_v52 = vadd.f32 %v1281_v50, %v1267_v33  ;;  %1232 = vst [vmem:[%s2680_s4 + $0x38] sm:$0xff] %v1216_v35  ;;  %v1215_v54 = vadd.f32 %v1160_v34, %v1021_v1  ;;  %v1245_v59 = vadd.f32 %v1244_v32, %v1214_v19  ;;  %v1270_v58 = vmul.f32 %v1216_v35, %v1216_v35 }
 0x153   :  { %1240 = vst [vmem:[%s2680_s4 + $0x78] sm:$0xff] %v1224_v8  ;;  %v1223_v4 = vadd.f32 %v1200_v51, %v1029_v40  ;;  %v1278_v45 = vmul.f32 %v1224_v8, %v1224_v8 }
 0x154   :  { %1231 = vst [vmem:[%s2680_s4 + $0x30] sm:$0xff] %v1215_v54  ;;  %v1246_v24 = vadd.f32 %v1245_v59, %v1215_v54  ;;  %v1269_v60 = vmul.f32 %v1215_v54, %v1215_v54  ;;  %v1283_v63 = vadd.f32 %v1282_v52, %v1268_v49 }
 0x155   :  { %1239 = vst [vmem:[%s2680_s4 + $0x70] sm:$0xff] %v1223_v4  ;;  %v1277_v16 = vmul.f32 %v1223_v4, %v1223_v4 }
 0x156   :  { %v1247_v23 = vadd.f32 %v1246_v24, %v1216_v35  ;;  %v1284_v2 = vadd.f32 %v1283_v63, %v1269_v60 }
 0x158   :  { %v1248_v61 = vadd.f32 %v1247_v23, %v2590_v36  ;;  %v1285_v30 = vadd.f32 %v1284_v2, %v1270_v58  ;;  %v1275_v36 = vmul.f32 %v1221_v5, %v1221_v5 }
 0x15a   :  { %v1249_v55 = vadd.f32 %v1248_v61, %v2573_v57  ;;  %v1286_v6 = vadd.f32 %v1285_v30, %v1271_v28 }
 0x15c   :  { %v1287_v9 = vadd.f32 %v1286_v6, %v1272_v43  ;;  %v1250_v11 = vadd.f32 %v1249_v55, %v2610_v3 }
 0x15e   :  { %v1251_v56 = vadd.f32 %v1250_v11, %v2605_v62  ;;  %v1288_v13 = vadd.f32 %v1287_v9, %v1273_v31 }
 0x160   :  { %v1252_v14 = vadd.f32 %v1251_v56, %v1221_v5  ;;  %v1289_v15 = vadd.f32 %v1288_v13, %v1274_v12 }
 0x162   :  { %v1253_v47 = vadd.f32 %v1252_v14, %v1222_v46  ;;  %v1290_v38 = vadd.f32 %v1289_v15, %v1275_v36 }
 0x164   :  { %v1254_v57 = vadd.f32 %v1253_v47, %v1223_v4  ;;  %v1291_v53 = vadd.f32 %v1290_v38, %v1276_v18 }
 0x166   :  { %v1255_v20 = vadd.f32 %v1254_v57, %v1224_v8  ;;  %v1292_v21 = vadd.f32 %v1291_v53, %v1277_v16 }
 0x168   :  { %v1256_v37 = vrot.slane %v1255_v20, 4  ;;  %v1293_v3 = vadd.f32 %v1292_v21, %v1278_v45 }
 0x16a   :  { %v1257_v19 = vadd.f32 %v1256_v37, %v1255_v20  ;;  %v1294_v41 = vrot.slane %v1293_v3, 4 }
 0x16c   :  { %v1258_v44 = vrot.slane %v1257_v19, 2  ;;  %v1295_v48 = vadd.f32 %v1294_v41, %v1293_v3 }
 0x16e   :  { %v1259_v62 = vadd.f32 %v1258_v44, %v1257_v19  ;;  %v1296_v39 = vrot.slane %v1295_v48, 2 }
 0x170   :  { %v1260_v22 = vrot.slane %v1259_v62, 1  ;;  %v1297_v25 = vadd.f32 %v1296_v39, %v1295_v48 }
 0x172   :  { %v1261_v7 = vadd.f32 %v1260_v22, %v1259_v62  ;;  %v1298_v42 = vrot.slane %v1297_v25, 1 }
 0x174   :  { %1262 = vst [vmem:[%s2681_s5] sm:$0x1] %v1261_v7  ;;  %v1299_v46 = vadd.f32 %v1298_v42, %v1297_v25 }
 0x176   :  { %1300 = vst [vmem:[%s2681_s5 + $0x1] sm:$0x1] %v1299_v46 }

</bundles_post_ra>
